<compile_context>
chip_gen: v6e
topology: v6e:2x2x1
jax: 0.10.0
libtpu: 0.0.40
codegen_flags: <defaults>
</compile_context>

<pallas_src>
import jax
import jax.numpy as jnp
from jax import lax
from jax.experimental import pallas as pl
from jax.experimental.pallas import tpu as pltpu

H = 10             # GRU hidden size (nn.GRU(1, 10))
L = 128            # lane stride per gate (vreg lane width)
ONE_LANE = H       # lane that carries the constant 1.0 used to fold b_hn
Z_LOCK = 40.0      # sigmoid(40) == 1.0 in f32 -> locks the bias lane of h


def gru_fc_kernel(x_ref, wi_ref, wh_ref, bx_ref, fcw_ref, fcb_ref, out_ref):
    S = out_ref.shape[0]

    x = x_ref[...]        # (S, 1)
    wi = wi_ref[...]      # (1, 3L)   input weights, gate blocks (r | z | n)
    wh = wh_ref[...]      # (L, 3L)   recurrent weights + b_hn in row ONE_LANE
    bx = bx_ref[...]      # (1, 3L)   [b_ir+b_hr | b_iz+b_hz (+Z_LOCK) | b_in]
    fcw = fcw_ref[...]    # (1, L)    fc.weight row (padded with zeros)
    fcb = fcb_ref[...]    # (1, 1)    fc.bias

    # Input-side pre-activations for the whole sequence: the input dim is 1,
    # so this is a broadcast outer product on the VPU (no MXU involvement).
    gx = x * wi + bx                                          # (S, 3L)

    # Hidden state: lanes 0..H-1 hold h, lane ONE_LANE holds a constant 1.0
    # (the b_hn bias lane), remaining lanes stay exactly 0.
    lane_ids = lax.broadcasted_iota(jnp.int32, (1, L), 1)     # (1, L)
    h = (lane_ids == ONE_LANE).astype(jnp.float32)            # (1, L)

    # Row selector for the in-register history select (S=8, L=128 -> 1 vreg).
    row_ids = lax.broadcasted_iota(jnp.int32, (S, L), 0)      # (S, L)
    hs = jnp.zeros((S, L), jnp.float32)

    # Fully unrolled recurrence (S is a small compile-time constant): one
    # (1,L)x(L,3L) MXU matmul per step with a loop-invariant RHS, everything
    # else on VPU/EUP; no VMEM traffic inside the loop.
    # NOTE: if S ever grows beyond ~16-32, switch to lax.fori_loop with gx/hs
    # in small VMEM scratch to avoid vreg spills (64-vreg file on all gens).
    for t in range(S):
        # gh includes b_hn in the n block via the constant-1 lane of h.
        gh = jnp.dot(h, wh, preferred_element_type=jnp.float32)   # (1, 3L)
        gxt = gx[t:t + 1, :]                                       # (1, 3L)
        # One fused sigmoid over the r|z blocks (single EUP chain).
        rz = jax.nn.sigmoid(gxt[:, 0:2 * L] + gh[:, 0:2 * L])      # (1, 2L)
        r = rz[:, 0:L]
        z = rz[:, L:2 * L]
        n = jnp.tanh(gxt[:, 2 * L:3 * L] + r * gh[:, 2 * L:3 * L])
        # z at ONE_LANE is exactly 1.0 (Z_LOCK), so the bias lane stays 1.0;
        # padded lanes stay exactly 0.
        h = (1.0 - z) * n + z * h                                  # (1, L)
        hs = jnp.where(row_ids == t, h, hs)                        # row t

    # Linear(10, 1): VPU multiply + lane reduction over the in-register
    # history (fcw is zero outside lanes 0..H-1, so the bias lane drops out);
    # single (S, 1) store.
    out_ref[...] = jnp.sum(hs * fcw, axis=1, keepdims=True) + fcb


def model_forward(x, packed):
    """x: (S, 1) f32 -> (S, 1) f32 (GRU over S steps + Linear)."""
    S = x.shape[0]
    vmem = pl.BlockSpec(memory_space=pltpu.MemorySpace.VMEM)
    args = (x, packed["wi"], packed["wh"], packed["bx"],
            packed["fcw"], packed["fcb"])
    # Footprint is a few KB, far below VMEM on every generation; gridless
    # single program.  If this is ever batched, add a leading batch grid axis
    # with dimension_semantics=("parallel",) so v7x's two TensorCores run
    # independent sequences — a single recurrence can only use one TC.
    return pl.pallas_call(
        gru_fc_kernel,
        out_shape=jax.ShapeDtypeStruct((S, 1), jnp.float32),
        in_specs=[vmem] * len(args),
        out_specs=vmem,
    )(*args)


def init_params(key):
    """PyTorch-default-shaped GRU/Linear params (raw) + kernel packing."""
    k = 1.0 / jnp.sqrt(jnp.float32(H))
    keys = jax.random.split(key, 6)
    u = lambda kk, shape: jax.random.uniform(kk, shape, jnp.float32, -k, k)

    raw = {
        "w_ih": u(keys[0], (3 * H, 1)),   # weight_ih_l0, gate order (r, z, n)
        "w_hh": u(keys[1], (3 * H, H)),   # weight_hh_l0
        "b_ih": u(keys[2], (3 * H,)),     # bias_ih_l0
        "b_hh": u(keys[3], (3 * H,)),     # bias_hh_l0
        "fc_w": u(keys[4], (1, H)),       # fc.weight
        "fc_b": u(keys[5], (1,)),         # fc.bias
    }
    return raw, pack_params(raw)


def pack_params(raw):
    """Pack raw PyTorch-layout params into the 128-lane-aligned kernel layout."""
    w_ih, w_hh = raw["w_ih"], raw["w_hh"]
    b_ih, b_hh = raw["b_ih"], raw["b_hh"]

    wi = jnp.zeros((1, 3 * L), jnp.float32)
    wh = jnp.zeros((L, 3 * L), jnp.float32)
    bx = jnp.zeros((1, 3 * L), jnp.float32)

    for g in range(3):                       # gate blocks: 0=r, 1=z, 2=n
        cols = slice(g * L, g * L + H)
        wi = wi.at[0, cols].set(w_ih[g * H:(g + 1) * H, 0])
        wh = wh.at[0:H, cols].set(w_hh[g * H:(g + 1) * H, :].T)

    # Folded biases: b_ir+b_hr and b_iz+b_hz go into bx (they sit outside the
    # r gate), b_in goes into bx's n block, b_hn goes into wh's bias row so it
    # stays inside the r-gated term and rides the MXU matmul for free.
    bx = bx.at[0, 0:H].set(b_ih[0:H] + b_hh[0:H])
    bx = bx.at[0, L:L + H].set(b_ih[H:2 * H] + b_hh[H:2 * H])
    bx = bx.at[0, 2 * L:2 * L + H].set(b_ih[2 * H:3 * H])
    bx = bx.at[0, L + ONE_LANE].set(Z_LOCK)          # locks h[ONE_LANE] == 1.0
    wh = wh.at[ONE_LANE, 2 * L:2 * L + H].set(b_hh[2 * H:3 * H])

    fcw = jnp.zeros((1, L), jnp.float32).at[0, 0:H].set(raw["fc_w"][0])
    fcb = raw["fc_b"].reshape(1, 1)

    return {"wi": wi, "wh": wh, "bx": bx, "fcw": fcw, "fcb": fcb}


def reference_forward(x, raw):
    """Pure-JAX reference of the PyTorch forward using the UNPACKED params."""
    w_ih, w_hh = raw["w_ih"], raw["w_hh"]
    b_ih, b_hh = raw["b_ih"], raw["b_hh"]
    W_ir, W_iz, W_in = w_ih[0:H], w_ih[H:2 * H], w_ih[2 * H:3 * H]
    W_hr, W_hz, W_hn = w_hh[0:H], w_hh[H:2 * H], w_hh[2 * H:3 * H]
    b_ir, b_iz, b_in = b_ih[0:H], b_ih[H:2 * H], b_ih[2 * H:3 * H]
    b_hr, b_hz, b_hn = b_hh[0:H], b_hh[H:2 * H], b_hh[2 * H:3 * H]

    def step(h, xt):                                     # h: (H,), xt: (1,)
        r = jax.nn.sigmoid(W_ir @ xt + b_ir + W_hr @ h + b_hr)
        z = jax.nn.sigmoid(W_iz @ xt + b_iz + W_hz @ h + b_hz)
        n = jnp.tanh(W_in @ xt + b_in + r * (W_hn @ h + b_hn))
        h_new = (1.0 - z) * n + z * h
        return h_new, h_new

    h0 = jnp.zeros((H,), jnp.float32)
    _, hs = lax.scan(step, h0, x)                        # (S, H)
    return hs @ raw["fc_w"].T + raw["fc_b"]              # (S, 1)


if __name__ == "__main__":
    key = jax.random.PRNGKey(0)
    k_x, k_p = jax.random.split(key)

    S = 8  # sequence length (x.reshape(-1, 1) -> (S, 1))
    x = jax.random.normal(k_x, (S,), dtype=jnp.float32).reshape(-1, 1)

    raw_params, packed_params = init_params(k_p)

    y = jax.block_until_ready(model_forward(x, packed_params))
    y_ref = reference_forward(x, raw_params)

    assert y.shape == (S, 1)
    assert jnp.allclose(y, y_ref, rtol=1e-4, atol=1e-4), \
        "Pallas kernel mismatch vs unpacked PyTorch-semantics reference"

    print("KERNEL_OK")
</pallas_src>

<mosaic_0001>
module attributes {stable_mosaic.version = 11 : i64} {
  func.func @gru_fc_kernel(%arg0: memref<8x1xf32, #tpu.memory_space<vmem>>, %arg1: memref<1x384xf32, #tpu.memory_space<vmem>>, %arg2: memref<128x384xf32, #tpu.memory_space<vmem>>, %arg3: memref<1x384xf32, #tpu.memory_space<vmem>>, %arg4: memref<1x128xf32, #tpu.memory_space<vmem>>, %arg5: memref<1x1xf32, #tpu.memory_space<vmem>>, %arg6: memref<8x1xf32, #tpu.memory_space<vmem>>) attributes {dimension_semantics = [], scalar_prefetch = 0 : i64, scratch_operands = 0 : i64, tpu.core_type = #tpu.core_type<tc>} {
    %c0 = arith.constant 0 : index
    %c0_0 = arith.constant 0 : index
    %0 = vector.load %arg0[%c0, %c0_0] : memref<8x1xf32, #tpu.memory_space<vmem>>, vector<8x1xf32>
    %c0_1 = arith.constant 0 : index
    %c0_2 = arith.constant 0 : index
    %1 = vector.load %arg1[%c0_1, %c0_2] : memref<1x384xf32, #tpu.memory_space<vmem>>, vector<1x384xf32>
    %c0_3 = arith.constant 0 : index
    %c0_4 = arith.constant 0 : index
    %2 = vector.load %arg2[%c0_3, %c0_4] : memref<128x384xf32, #tpu.memory_space<vmem>>, vector<128x384xf32>
    %c0_5 = arith.constant 0 : index
    %c0_6 = arith.constant 0 : index
    %3 = vector.load %arg3[%c0_5, %c0_6] : memref<1x384xf32, #tpu.memory_space<vmem>>, vector<1x384xf32>
    %c0_7 = arith.constant 0 : index
    %c0_8 = arith.constant 0 : index
    %4 = vector.load %arg4[%c0_7, %c0_8] : memref<1x128xf32, #tpu.memory_space<vmem>>, vector<1x128xf32>
    %c0_9 = arith.constant 0 : index
    %c0_10 = arith.constant 0 : index
    %5 = vector.load %arg5[%c0_9, %c0_10] : memref<1x1xf32, #tpu.memory_space<vmem>>, vector<1x1xf32>
    %6 = vector.broadcast %0 : vector<8x1xf32> to vector<8x384xf32>
    %7 = vector.broadcast %1 : vector<1x384xf32> to vector<8x384xf32>
    %8 = arith.mulf %6, %7 : vector<8x384xf32>
    %9 = vector.broadcast %3 : vector<1x384xf32> to vector<8x384xf32>
    %10 = arith.addf %8, %9 : vector<8x384xf32>
    %11 = tpu.iota {dimensions = array<i32: 1>} : vector<1x128xi32>
    %c10_i32 = arith.constant 10 : i32
    %12 = vector.broadcast %c10_i32 : i32 to vector<1x128xi32>
    %13 = arith.cmpi eq, %11, %12 : vector<1x128xi32>
    %14 = arith.extui %13 : vector<1x128xi1> to vector<1x128xi32>
    %15 = arith.sitofp %14 : vector<1x128xi32> to vector<1x128xf32>
    %16 = tpu.iota {dimensions = array<i32: 0>} : vector<8x128xi32>
    %cst = arith.constant 0.000000e+00 : f32
    %17 = vector.broadcast %cst : f32 to vector<8x128xf32>
    %cst_11 = arith.constant dense<0.000000e+00> : vector<1x384xf32>
    %18 = tpu.matmul %15, %2, %cst_11 {dimension_numbers = #tpu.dot_dimension_numbers<[1], [0], [0], [1], [0, 0, 1, 1], [], []>} : vector<1x128xf32>, vector<128x384xf32>, vector<1x384xf32> -> vector<1x384xf32>
    %19 = vector.extract_strided_slice %10 {offsets = [0, 0], sizes = [1, 384], strides = [1, 1]} : vector<8x384xf32> to vector<1x384xf32>
    %20 = vector.extract_strided_slice %19 {offsets = [0, 0], sizes = [1, 256], strides = [1, 1]} : vector<1x384xf32> to vector<1x256xf32>
    %21 = vector.extract_strided_slice %18 {offsets = [0, 0], sizes = [1, 256], strides = [1, 1]} : vector<1x384xf32> to vector<1x256xf32>
    %22 = arith.addf %20, %21 : vector<1x256xf32>
    %23 = arith.negf %22 : vector<1x256xf32>
    %24 = math.exp %23 : vector<1x256xf32>
    %cst_12 = arith.constant 1.000000e+00 : f32
    %25 = vector.broadcast %cst_12 : f32 to vector<1x256xf32>
    %26 = arith.addf %25, %24 : vector<1x256xf32>
    %27 = arith.divf %25, %26 : vector<1x256xf32>
    %28 = vector.extract_strided_slice %27 {offsets = [0, 0], sizes = [1, 128], strides = [1, 1]} : vector<1x256xf32> to vector<1x128xf32>
    %29 = vector.extract_strided_slice %27 {offsets = [0, 128], sizes = [1, 128], strides = [1, 1]} : vector<1x256xf32> to vector<1x128xf32>
    %30 = vector.extract_strided_slice %19 {offsets = [0, 256], sizes = [1, 128], strides = [1, 1]} : vector<1x384xf32> to vector<1x128xf32>
    %31 = vector.extract_strided_slice %18 {offsets = [0, 256], sizes = [1, 128], strides = [1, 1]} : vector<1x384xf32> to vector<1x128xf32>
    %32 = arith.mulf %28, %31 : vector<1x128xf32>
    %33 = arith.addf %30, %32 : vector<1x128xf32>
    %34 = math.tanh %33 : vector<1x128xf32>
    %cst_13 = arith.constant 1.000000e+00 : f32
    %35 = vector.broadcast %cst_13 : f32 to vector<1x128xf32>
    %36 = arith.subf %35, %29 : vector<1x128xf32>
    %37 = arith.mulf %36, %34 : vector<1x128xf32>
    %38 = arith.mulf %29, %15 : vector<1x128xf32>
    %39 = arith.addf %37, %38 : vector<1x128xf32>
    %c0_i32 = arith.constant 0 : i32
    %40 = vector.broadcast %c0_i32 : i32 to vector<8x128xi32>
    %41 = arith.cmpi eq, %16, %40 : vector<8x128xi32>
    %42 = vector.shape_cast %39 : vector<1x128xf32> to vector<1x128xf32>
    %43 = vector.broadcast %42 : vector<1x128xf32> to vector<8x128xf32>
    %44 = arith.select %41, %43, %17 : vector<8x128xi1>, vector<8x128xf32>
    %cst_14 = arith.constant dense<0.000000e+00> : vector<1x384xf32>
    %45 = tpu.matmul %39, %2, %cst_14 {dimension_numbers = #tpu.dot_dimension_numbers<[1], [0], [0], [1], [0, 0, 1, 1], [], []>} : vector<1x128xf32>, vector<128x384xf32>, vector<1x384xf32> -> vector<1x384xf32>
    %46 = vector.extract_strided_slice %10 {offsets = [1, 0], sizes = [1, 384], strides = [1, 1]} : vector<8x384xf32> to vector<1x384xf32>
    %47 = vector.extract_strided_slice %46 {offsets = [0, 0], sizes = [1, 256], strides = [1, 1]} : vector<1x384xf32> to vector<1x256xf32>
    %48 = vector.extract_strided_slice %45 {offsets = [0, 0], sizes = [1, 256], strides = [1, 1]} : vector<1x384xf32> to vector<1x256xf32>
    %49 = arith.addf %47, %48 : vector<1x256xf32>
    %50 = arith.negf %49 : vector<1x256xf32>
    %51 = math.exp %50 : vector<1x256xf32>
    %cst_15 = arith.constant 1.000000e+00 : f32
    %52 = vector.broadcast %cst_15 : f32 to vector<1x256xf32>
    %53 = arith.addf %52, %51 : vector<1x256xf32>
    %54 = arith.divf %52, %53 : vector<1x256xf32>
    %55 = vector.extract_strided_slice %54 {offsets = [0, 0], sizes = [1, 128], strides = [1, 1]} : vector<1x256xf32> to vector<1x128xf32>
    %56 = vector.extract_strided_slice %54 {offsets = [0, 128], sizes = [1, 128], strides = [1, 1]} : vector<1x256xf32> to vector<1x128xf32>
    %57 = vector.extract_strided_slice %46 {offsets = [0, 256], sizes = [1, 128], strides = [1, 1]} : vector<1x384xf32> to vector<1x128xf32>
    %58 = vector.extract_strided_slice %45 {offsets = [0, 256], sizes = [1, 128], strides = [1, 1]} : vector<1x384xf32> to vector<1x128xf32>
    %59 = arith.mulf %55, %58 : vector<1x128xf32>
    %60 = arith.addf %57, %59 : vector<1x128xf32>
    %61 = math.tanh %60 : vector<1x128xf32>
    %cst_16 = arith.constant 1.000000e+00 : f32
    %62 = vector.broadcast %cst_16 : f32 to vector<1x128xf32>
    %63 = arith.subf %62, %56 : vector<1x128xf32>
    %64 = arith.mulf %63, %61 : vector<1x128xf32>
    %65 = arith.mulf %56, %39 : vector<1x128xf32>
    %66 = arith.addf %64, %65 : vector<1x128xf32>
    %c1_i32 = arith.constant 1 : i32
    %67 = vector.broadcast %c1_i32 : i32 to vector<8x128xi32>
    %68 = arith.cmpi eq, %16, %67 : vector<8x128xi32>
    %69 = vector.shape_cast %66 : vector<1x128xf32> to vector<1x128xf32>
    %70 = vector.broadcast %69 : vector<1x128xf32> to vector<8x128xf32>
    %71 = arith.select %68, %70, %44 : vector<8x128xi1>, vector<8x128xf32>
    %cst_17 = arith.constant dense<0.000000e+00> : vector<1x384xf32>
    %72 = tpu.matmul %66, %2, %cst_17 {dimension_numbers = #tpu.dot_dimension_numbers<[1], [0], [0], [1], [0, 0, 1, 1], [], []>} : vector<1x128xf32>, vector<128x384xf32>, vector<1x384xf32> -> vector<1x384xf32>
    %73 = vector.extract_strided_slice %10 {offsets = [2, 0], sizes = [1, 384], strides = [1, 1]} : vector<8x384xf32> to vector<1x384xf32>
    %74 = vector.extract_strided_slice %73 {offsets = [0, 0], sizes = [1, 256], strides = [1, 1]} : vector<1x384xf32> to vector<1x256xf32>
    %75 = vector.extract_strided_slice %72 {offsets = [0, 0], sizes = [1, 256], strides = [1, 1]} : vector<1x384xf32> to vector<1x256xf32>
    %76 = arith.addf %74, %75 : vector<1x256xf32>
    %77 = arith.negf %76 : vector<1x256xf32>
    %78 = math.exp %77 : vector<1x256xf32>
    %cst_18 = arith.constant 1.000000e+00 : f32
    %79 = vector.broadcast %cst_18 : f32 to vector<1x256xf32>
    %80 = arith.addf %79, %78 : vector<1x256xf32>
    %81 = arith.divf %79, %80 : vector<1x256xf32>
    %82 = vector.extract_strided_slice %81 {offsets = [0, 0], sizes = [1, 128], strides = [1, 1]} : vector<1x256xf32> to vector<1x128xf32>
    %83 = vector.extract_strided_slice %81 {offsets = [0, 128], sizes = [1, 128], strides = [1, 1]} : vector<1x256xf32> to vector<1x128xf32>
    %84 = vector.extract_strided_slice %73 {offsets = [0, 256], sizes = [1, 128], strides = [1, 1]} : vector<1x384xf32> to vector<1x128xf32>
    %85 = vector.extract_strided_slice %72 {offsets = [0, 256], sizes = [1, 128], strides = [1, 1]} : vector<1x384xf32> to vector<1x128xf32>
    %86 = arith.mulf %82, %85 : vector<1x128xf32>
    %87 = arith.addf %84, %86 : vector<1x128xf32>
    %88 = math.tanh %87 : vector<1x128xf32>
    %cst_19 = arith.constant 1.000000e+00 : f32
    %89 = vector.broadcast %cst_19 : f32 to vector<1x128xf32>
    %90 = arith.subf %89, %83 : vector<1x128xf32>
    %91 = arith.mulf %90, %88 : vector<1x128xf32>
    %92 = arith.mulf %83, %66 : vector<1x128xf32>
    %93 = arith.addf %91, %92 : vector<1x128xf32>
    %c2_i32 = arith.constant 2 : i32
    %94 = vector.broadcast %c2_i32 : i32 to vector<8x128xi32>
    %95 = arith.cmpi eq, %16, %94 : vector<8x128xi32>
    %96 = vector.shape_cast %93 : vector<1x128xf32> to vector<1x128xf32>
    %97 = vector.broadcast %96 : vector<1x128xf32> to vector<8x128xf32>
    %98 = arith.select %95, %97, %71 : vector<8x128xi1>, vector<8x128xf32>
    %cst_20 = arith.constant dense<0.000000e+00> : vector<1x384xf32>
    %99 = tpu.matmul %93, %2, %cst_20 {dimension_numbers = #tpu.dot_dimension_numbers<[1], [0], [0], [1], [0, 0, 1, 1], [], []>} : vector<1x128xf32>, vector<128x384xf32>, vector<1x384xf32> -> vector<1x384xf32>
    %100 = vector.extract_strided_slice %10 {offsets = [3, 0], sizes = [1, 384], strides = [1, 1]} : vector<8x384xf32> to vector<1x384xf32>
    %101 = vector.extract_strided_slice %100 {offsets = [0, 0], sizes = [1, 256], strides = [1, 1]} : vector<1x384xf32> to vector<1x256xf32>
    %102 = vector.extract_strided_slice %99 {offsets = [0, 0], sizes = [1, 256], strides = [1, 1]} : vector<1x384xf32> to vector<1x256xf32>
    %103 = arith.addf %101, %102 : vector<1x256xf32>
    %104 = arith.negf %103 : vector<1x256xf32>
    %105 = math.exp %104 : vector<1x256xf32>
    %cst_21 = arith.constant 1.000000e+00 : f32
    %106 = vector.broadcast %cst_21 : f32 to vector<1x256xf32>
    %107 = arith.addf %106, %105 : vector<1x256xf32>
    %108 = arith.divf %106, %107 : vector<1x256xf32>
    %109 = vector.extract_strided_slice %108 {offsets = [0, 0], sizes = [1, 128], strides = [1, 1]} : vector<1x256xf32> to vector<1x128xf32>
    %110 = vector.extract_strided_slice %108 {offsets = [0, 128], sizes = [1, 128], strides = [1, 1]} : vector<1x256xf32> to vector<1x128xf32>
    %111 = vector.extract_strided_slice %100 {offsets = [0, 256], sizes = [1, 128], strides = [1, 1]} : vector<1x384xf32> to vector<1x128xf32>
    %112 = vector.extract_strided_slice %99 {offsets = [0, 256], sizes = [1, 128], strides = [1, 1]} : vector<1x384xf32> to vector<1x128xf32>
    %113 = arith.mulf %109, %112 : vector<1x128xf32>
    %114 = arith.addf %111, %113 : vector<1x128xf32>
    %115 = math.tanh %114 : vector<1x128xf32>
    %cst_22 = arith.constant 1.000000e+00 : f32
    %116 = vector.broadcast %cst_22 : f32 to vector<1x128xf32>
    %117 = arith.subf %116, %110 : vector<1x128xf32>
    %118 = arith.mulf %117, %115 : vector<1x128xf32>
    %119 = arith.mulf %110, %93 : vector<1x128xf32>
    %120 = arith.addf %118, %119 : vector<1x128xf32>
    %c3_i32 = arith.constant 3 : i32
    %121 = vector.broadcast %c3_i32 : i32 to vector<8x128xi32>
    %122 = arith.cmpi eq, %16, %121 : vector<8x128xi32>
    %123 = vector.shape_cast %120 : vector<1x128xf32> to vector<1x128xf32>
    %124 = vector.broadcast %123 : vector<1x128xf32> to vector<8x128xf32>
    %125 = arith.select %122, %124, %98 : vector<8x128xi1>, vector<8x128xf32>
    %cst_23 = arith.constant dense<0.000000e+00> : vector<1x384xf32>
    %126 = tpu.matmul %120, %2, %cst_23 {dimension_numbers = #tpu.dot_dimension_numbers<[1], [0], [0], [1], [0, 0, 1, 1], [], []>} : vector<1x128xf32>, vector<128x384xf32>, vector<1x384xf32> -> vector<1x384xf32>
    %127 = vector.extract_strided_slice %10 {offsets = [4, 0], sizes = [1, 384], strides = [1, 1]} : vector<8x384xf32> to vector<1x384xf32>
    %128 = vector.extract_strided_slice %127 {offsets = [0, 0], sizes = [1, 256], strides = [1, 1]} : vector<1x384xf32> to vector<1x256xf32>
    %129 = vector.extract_strided_slice %126 {offsets = [0, 0], sizes = [1, 256], strides = [1, 1]} : vector<1x384xf32> to vector<1x256xf32>
    %130 = arith.addf %128, %129 : vector<1x256xf32>
    %131 = arith.negf %130 : vector<1x256xf32>
    %132 = math.exp %131 : vector<1x256xf32>
    %cst_24 = arith.constant 1.000000e+00 : f32
    %133 = vector.broadcast %cst_24 : f32 to vector<1x256xf32>
    %134 = arith.addf %133, %132 : vector<1x256xf32>
    %135 = arith.divf %133, %134 : vector<1x256xf32>
    %136 = vector.extract_strided_slice %135 {offsets = [0, 0], sizes = [1, 128], strides = [1, 1]} : vector<1x256xf32> to vector<1x128xf32>
    %137 = vector.extract_strided_slice %135 {offsets = [0, 128], sizes = [1, 128], strides = [1, 1]} : vector<1x256xf32> to vector<1x128xf32>
    %138 = vector.extract_strided_slice %127 {offsets = [0, 256], sizes = [1, 128], strides = [1, 1]} : vector<1x384xf32> to vector<1x128xf32>
    %139 = vector.extract_strided_slice %126 {offsets = [0, 256], sizes = [1, 128], strides = [1, 1]} : vector<1x384xf32> to vector<1x128xf32>
    %140 = arith.mulf %136, %139 : vector<1x128xf32>
    %141 = arith.addf %138, %140 : vector<1x128xf32>
    %142 = math.tanh %141 : vector<1x128xf32>
    %cst_25 = arith.constant 1.000000e+00 : f32
    %143 = vector.broadcast %cst_25 : f32 to vector<1x128xf32>
    %144 = arith.subf %143, %137 : vector<1x128xf32>
    %145 = arith.mulf %144, %142 : vector<1x128xf32>
    %146 = arith.mulf %137, %120 : vector<1x128xf32>
    %147 = arith.addf %145, %146 : vector<1x128xf32>
    %c4_i32 = arith.constant 4 : i32
    %148 = vector.broadcast %c4_i32 : i32 to vector<8x128xi32>
    %149 = arith.cmpi eq, %16, %148 : vector<8x128xi32>
    %150 = vector.shape_cast %147 : vector<1x128xf32> to vector<1x128xf32>
    %151 = vector.broadcast %150 : vector<1x128xf32> to vector<8x128xf32>
    %152 = arith.select %149, %151, %125 : vector<8x128xi1>, vector<8x128xf32>
    %cst_26 = arith.constant dense<0.000000e+00> : vector<1x384xf32>
    %153 = tpu.matmul %147, %2, %cst_26 {dimension_numbers = #tpu.dot_dimension_numbers<[1], [0], [0], [1], [0, 0, 1, 1], [], []>} : vector<1x128xf32>, vector<128x384xf32>, vector<1x384xf32> -> vector<1x384xf32>
    %154 = vector.extract_strided_slice %10 {offsets = [5, 0], sizes = [1, 384], strides = [1, 1]} : vector<8x384xf32> to vector<1x384xf32>
    %155 = vector.extract_strided_slice %154 {offsets = [0, 0], sizes = [1, 256], strides = [1, 1]} : vector<1x384xf32> to vector<1x256xf32>
    %156 = vector.extract_strided_slice %153 {offsets = [0, 0], sizes = [1, 256], strides = [1, 1]} : vector<1x384xf32> to vector<1x256xf32>
    %157 = arith.addf %155, %156 : vector<1x256xf32>
    %158 = arith.negf %157 : vector<1x256xf32>
    %159 = math.exp %158 : vector<1x256xf32>
    %cst_27 = arith.constant 1.000000e+00 : f32
    %160 = vector.broadcast %cst_27 : f32 to vector<1x256xf32>
    %161 = arith.addf %160, %159 : vector<1x256xf32>
    %162 = arith.divf %160, %161 : vector<1x256xf32>
    %163 = vector.extract_strided_slice %162 {offsets = [0, 0], sizes = [1, 128], strides = [1, 1]} : vector<1x256xf32> to vector<1x128xf32>
    %164 = vector.extract_strided_slice %162 {offsets = [0, 128], sizes = [1, 128], strides = [1, 1]} : vector<1x256xf32> to vector<1x128xf32>
    %165 = vector.extract_strided_slice %154 {offsets = [0, 256], sizes = [1, 128], strides = [1, 1]} : vector<1x384xf32> to vector<1x128xf32>
    %166 = vector.extract_strided_slice %153 {offsets = [0, 256], sizes = [1, 128], strides = [1, 1]} : vector<1x384xf32> to vector<1x128xf32>
    %167 = arith.mulf %163, %166 : vector<1x128xf32>
    %168 = arith.addf %165, %167 : vector<1x128xf32>
    %169 = math.tanh %168 : vector<1x128xf32>
    %cst_28 = arith.constant 1.000000e+00 : f32
    %170 = vector.broadcast %cst_28 : f32 to vector<1x128xf32>
    %171 = arith.subf %170, %164 : vector<1x128xf32>
    %172 = arith.mulf %171, %169 : vector<1x128xf32>
    %173 = arith.mulf %164, %147 : vector<1x128xf32>
    %174 = arith.addf %172, %173 : vector<1x128xf32>
    %c5_i32 = arith.constant 5 : i32
    %175 = vector.broadcast %c5_i32 : i32 to vector<8x128xi32>
    %176 = arith.cmpi eq, %16, %175 : vector<8x128xi32>
    %177 = vector.shape_cast %174 : vector<1x128xf32> to vector<1x128xf32>
    %178 = vector.broadcast %177 : vector<1x128xf32> to vector<8x128xf32>
    %179 = arith.select %176, %178, %152 : vector<8x128xi1>, vector<8x128xf32>
    %cst_29 = arith.constant dense<0.000000e+00> : vector<1x384xf32>
    %180 = tpu.matmul %174, %2, %cst_29 {dimension_numbers = #tpu.dot_dimension_numbers<[1], [0], [0], [1], [0, 0, 1, 1], [], []>} : vector<1x128xf32>, vector<128x384xf32>, vector<1x384xf32> -> vector<1x384xf32>
    %181 = vector.extract_strided_slice %10 {offsets = [6, 0], sizes = [1, 384], strides = [1, 1]} : vector<8x384xf32> to vector<1x384xf32>
    %182 = vector.extract_strided_slice %181 {offsets = [0, 0], sizes = [1, 256], strides = [1, 1]} : vector<1x384xf32> to vector<1x256xf32>
    %183 = vector.extract_strided_slice %180 {offsets = [0, 0], sizes = [1, 256], strides = [1, 1]} : vector<1x384xf32> to vector<1x256xf32>
    %184 = arith.addf %182, %183 : vector<1x256xf32>
    %185 = arith.negf %184 : vector<1x256xf32>
    %186 = math.exp %185 : vector<1x256xf32>
    %cst_30 = arith.constant 1.000000e+00 : f32
    %187 = vector.broadcast %cst_30 : f32 to vector<1x256xf32>
    %188 = arith.addf %187, %186 : vector<1x256xf32>
    %189 = arith.divf %187, %188 : vector<1x256xf32>
    %190 = vector.extract_strided_slice %189 {offsets = [0, 0], sizes = [1, 128], strides = [1, 1]} : vector<1x256xf32> to vector<1x128xf32>
    %191 = vector.extract_strided_slice %189 {offsets = [0, 128], sizes = [1, 128], strides = [1, 1]} : vector<1x256xf32> to vector<1x128xf32>
    %192 = vector.extract_strided_slice %181 {offsets = [0, 256], sizes = [1, 128], strides = [1, 1]} : vector<1x384xf32> to vector<1x128xf32>
    %193 = vector.extract_strided_slice %180 {offsets = [0, 256], sizes = [1, 128], strides = [1, 1]} : vector<1x384xf32> to vector<1x128xf32>
    %194 = arith.mulf %190, %193 : vector<1x128xf32>
    %195 = arith.addf %192, %194 : vector<1x128xf32>
    %196 = math.tanh %195 : vector<1x128xf32>
    %cst_31 = arith.constant 1.000000e+00 : f32
    %197 = vector.broadcast %cst_31 : f32 to vector<1x128xf32>
    %198 = arith.subf %197, %191 : vector<1x128xf32>
    %199 = arith.mulf %198, %196 : vector<1x128xf32>
    %200 = arith.mulf %191, %174 : vector<1x128xf32>
    %201 = arith.addf %199, %200 : vector<1x128xf32>
    %c6_i32 = arith.constant 6 : i32
    %202 = vector.broadcast %c6_i32 : i32 to vector<8x128xi32>
    %203 = arith.cmpi eq, %16, %202 : vector<8x128xi32>
    %204 = vector.shape_cast %201 : vector<1x128xf32> to vector<1x128xf32>
    %205 = vector.broadcast %204 : vector<1x128xf32> to vector<8x128xf32>
    %206 = arith.select %203, %205, %179 : vector<8x128xi1>, vector<8x128xf32>
    %cst_32 = arith.constant dense<0.000000e+00> : vector<1x384xf32>
    %207 = tpu.matmul %201, %2, %cst_32 {dimension_numbers = #tpu.dot_dimension_numbers<[1], [0], [0], [1], [0, 0, 1, 1], [], []>} : vector<1x128xf32>, vector<128x384xf32>, vector<1x384xf32> -> vector<1x384xf32>
    %208 = vector.extract_strided_slice %10 {offsets = [7, 0], sizes = [1, 384], strides = [1, 1]} : vector<8x384xf32> to vector<1x384xf32>
    %209 = vector.extract_strided_slice %208 {offsets = [0, 0], sizes = [1, 256], strides = [1, 1]} : vector<1x384xf32> to vector<1x256xf32>
    %210 = vector.extract_strided_slice %207 {offsets = [0, 0], sizes = [1, 256], strides = [1, 1]} : vector<1x384xf32> to vector<1x256xf32>
    %211 = arith.addf %209, %210 : vector<1x256xf32>
    %212 = arith.negf %211 : vector<1x256xf32>
    %213 = math.exp %212 : vector<1x256xf32>
    %cst_33 = arith.constant 1.000000e+00 : f32
    %214 = vector.broadcast %cst_33 : f32 to vector<1x256xf32>
    %215 = arith.addf %214, %213 : vector<1x256xf32>
    %216 = arith.divf %214, %215 : vector<1x256xf32>
    %217 = vector.extract_strided_slice %216 {offsets = [0, 0], sizes = [1, 128], strides = [1, 1]} : vector<1x256xf32> to vector<1x128xf32>
    %218 = vector.extract_strided_slice %216 {offsets = [0, 128], sizes = [1, 128], strides = [1, 1]} : vector<1x256xf32> to vector<1x128xf32>
    %219 = vector.extract_strided_slice %208 {offsets = [0, 256], sizes = [1, 128], strides = [1, 1]} : vector<1x384xf32> to vector<1x128xf32>
    %220 = vector.extract_strided_slice %207 {offsets = [0, 256], sizes = [1, 128], strides = [1, 1]} : vector<1x384xf32> to vector<1x128xf32>
    %221 = arith.mulf %217, %220 : vector<1x128xf32>
    %222 = arith.addf %219, %221 : vector<1x128xf32>
    %223 = math.tanh %222 : vector<1x128xf32>
    %cst_34 = arith.constant 1.000000e+00 : f32
    %224 = vector.broadcast %cst_34 : f32 to vector<1x128xf32>
    %225 = arith.subf %224, %218 : vector<1x128xf32>
    %226 = arith.mulf %225, %223 : vector<1x128xf32>
    %227 = arith.mulf %218, %201 : vector<1x128xf32>
    %228 = arith.addf %226, %227 : vector<1x128xf32>
    %c7_i32 = arith.constant 7 : i32
    %229 = vector.broadcast %c7_i32 : i32 to vector<8x128xi32>
    %230 = arith.cmpi eq, %16, %229 : vector<8x128xi32>
    %231 = vector.shape_cast %228 : vector<1x128xf32> to vector<1x128xf32>
    %232 = vector.broadcast %231 : vector<1x128xf32> to vector<8x128xf32>
    %233 = arith.select %230, %232, %206 : vector<8x128xi1>, vector<8x128xf32>
    %234 = vector.broadcast %4 : vector<1x128xf32> to vector<8x128xf32>
    %235 = arith.mulf %233, %234 : vector<8x128xf32>
    %cst_35 = arith.constant dense<0.000000e+00> : vector<8xf32>
    %236 = vector.multi_reduction <add>, %235, %cst_35 [1] : vector<8x128xf32> to vector<8xf32>
    %237 = vector.shape_cast %236 : vector<8xf32> to vector<8x1xf32>
    %238 = vector.broadcast %5 : vector<1x1xf32> to vector<8x1xf32>
    %239 = arith.addf %237, %238 : vector<8x1xf32>
    %c0_36 = arith.constant 0 : index
    %c0_37 = arith.constant 0 : index
    %240 = vector.load %arg6[%c0_36, %c0_37] : memref<8x1xf32, #tpu.memory_space<vmem>>, vector<8x1xf32>
    tpu.vector_store %arg6[%c0_36, %c0_37], %239 {strides = array<i32>} : memref<8x1xf32, #tpu.memory_space<vmem>>, vector<8x1xf32>,
    return
  }
}

</mosaic_0001>

<bundles_post_ra>
// kernel: tpu_custom_call.1
= control target key start
LH: loop header
LB: loop body
LE: loop exit
PB: predicated region body
PF: predicated region fallthrough
CT: control target
= control target key end

     0   :  { %s3112_s0 = inlined_call_operand.vmem [shape: f32[8,1], index: 0, kind: input, shape index: {}]   ;;  %s3113_s1 = inlined_call_operand.vmem [shape: f32[1,384], index: 1, kind: input, shape index: {}]   ;;  %s3114_s2 = inlined_call_operand.hbm [shape: f32[128,384], index: 2, kind: input, shape index: {}]   ;;  %s3115_s3 = inlined_call_operand.vmem [shape: f32[1,384], index: 3, kind: input, shape index: {}]   ;;  %s3116_s4 = inlined_call_operand.vmem [shape: f32[1,128], index: 4, kind: input, shape index: {}]   ;;  %s3117_s5 = inlined_call_operand.<no memory space> [shape: f32[1,1], index: 5, kind: input, shape index: {}]   ;;  %s3118_s6 = inlined_call_operand.vmem [shape: f32[8,1], index: 6, kind: output, shape index: {}]  }
   0x1   :  { %v11_v0 = vstv %s3117_s5 }
   0x2   :  { %12 = vst [vmem:[#allocation2] sm:$0x1] %v11_v0 }
   0x3   :  { %13 = vsyncpa [#allocation4], 0  ;;  %s2200_s23 = smov [#allocation3]  }
   0x4   :  { %s23_s24 = sshll.u32 %s2200_s23, 4  ;;  %s24_s24 = int_to_ptr.vmem [resolvable:$true] %s23_s24 }
   0x5   :  { %s2186_s25 = scalar_lea.vmem %s24_s24, 6144  ;;  %p2191_p1 = scmp.lt.s32.totalorder %s24_s24, %s24_s24 }
   0x6   :  { %p2187_p0 = scmp.ne.s32.totalorder %s24_s24, %s2186_s25  ;;  %p2192_p2 = scmp.lt.s32.totalorder %s2186_s25, %s2186_s25 }
   0x8   :  { %p2193_p3 = por %p2192_p2, %p2191_p1 }
   0xa   :  { %p2194_p4 = pnand %p2193_p3, %p2187_p0 }
   0xc   :  { %2197 = shalt.err (!%p2194_p4)
}
   0xd   :  { %s2201_s26 = smov 384   ;;  %s2202_s27 = smov 24  }
   0xe   :  { %29 = dma.hbm_to_vmem [thread:$0]  %s3114_s2, 6144, %s24_s24, [#allocation4], %s2201_s26, %s2201_s26, %s2202_s27  }
   0xf   :  { %2198 = dma.done.wait [#allocation4], 6144  }
  0x10   :  { %2199 = vsyncadd [#allocation4], 4294961152  ;;  %v3119_v1 = vmov 0.0   ;;  %vm2204_vm0 = vmmov 0   ;;  %v2205_v2 = vmov 0   ;;  %v2252_v3 = vld [vmem:[#allocation3 + $0x170] sm:$0xff]  ;;  %v98_v35 = vlaneseq }
  0x11   :  { %206 = vmatprep.mubr.f32.mxu0 %v3119_v1  ;;  %1762 = vmatprep.subr.mxu1 %v3119_v1  ;;  %3150 = vst [vmem:[#allocation6_spill] sm:$0xff] %v2252_v3  ;;  %v2254_v4 = vld [vmem:[#allocation3 + $0x168] sm:$0xff]  ;;  %v2256_v5 = vld [vmem:[#allocation3 + $0x158] sm:$0xff]  ;;  %v2259_v6 = vld [vmem:[#allocation3 + $0x150] sm:$0xff]  ;;  %v2206_v51 = vmov 1.0   ;;  %vm1598_vm10 = vcmask 7168  }
  0x12   :  { %1794 = vmatprep.mubr.msk.f32.mxu1 %vm2204_vm0, %v3119_v1  ;;  %2049 = vset.pattern.permute.xlu0 %v2205_v2  ;;  %v2262_v7 = vld [vmem:[#allocation3 + $0x140] sm:$0xff]  ;;  %v2265_v8 = vld [vmem:[#allocation3 + $0x138] sm:$0xff]  ;;  %v2268_v9 = vld [vmem:[#allocation3 + $0x128] sm:$0xff]  ;;  %v2370_v42 = vand.u32 127, %v98_v35  ;;  %v2492_v55 = vshrl.u32 %v98_v35, 7 }
  0x13   :  { %142 = vmatprep.subr.mxu0 %v2252_v3  ;;  %v2271_v10 = vld [vmem:[#allocation3 + $0x120] sm:$0xff]  ;;  %v2274_v11 = vld [vmem:[#allocation3 + $0x110] sm:$0xff]  ;;  %v2277_v12 = vld [vmem:[#allocation3 + $0x108] sm:$0xff] }
  0x14   :  { %143 = vmatpush1.msra.mxu0 %v2254_v4  ;;  %v2280_v13 = vld [vmem:[#allocation3 + $0xf8] sm:$0xff]  ;;  %v2283_v14 = vld [vmem:[#allocation3 + $0xf0] sm:$0xff]  ;;  %v2286_v15 = vld [vmem:[#allocation3 + $0xe0] sm:$0xff]  ;;  %vm137_vm1 = vcmp.eq.s32.totalorder %v2370_v42, 10  ;;  %3158 = vst [vmem:[#allocation14_spill] sm:$0xff] %v2492_v55  ;;  %v2495_v56 = vsub.s32 0, %v2492_v55 }
  0x15   :  { %144 = vmatprep.subr.mxu0 %v2256_v5  ;;  %v2288_v16 = vld [vmem:[#allocation3 + $0x178] sm:$0xff]  ;;  %v2294_v18 = vld [vmem:[#allocation3 + $0x160] sm:$0xff]  ;;  %v2297_v19 = vld [vmem:[#allocation3 + $0xc8] sm:$0xff]  ;;  %v2505_v61 = vsub.s32 1, %v2492_v55 }
  0x16   :  { %145 = vmatpush1.msra.mxu0 %v2259_v6  ;;  %v2291_v17 = vld [vmem:[#allocation3 + $0xd8] sm:$0xff]  ;;  %1763 = vmatpush3.msra.mxu1 %v2288_v16  ;;  %v2300_v20 = vld [vmem:[#allocation3 + $0x148] sm:$0xff]  ;;  %v2303_v21 = vld [vmem:[#allocation3 + $0xc0] sm:$0xff]  ;;  %3159 = vst [vmem:[#allocation15_spill] sm:$0xff] %v2495_v56 }
  0x17   :  { %146 = vmatprep.subr.mxu0 %v2262_v7  ;;  %1764 = vmatprep.subr.mxu1 %v3119_v1  ;;  %v2307_v22 = vld [vmem:[#allocation3 + $0xb0] sm:$0xff]  ;;  %v2313_v24 = vld [vmem:[#allocation3 + $0xa8] sm:$0xff]  ;;  %v2317_v25 = vld [vmem:[#allocation3 + $0x98] sm:$0xff]  ;;  %3160 = vst [vmem:[#allocation16_spill] sm:$0xff] %v2505_v61 }
  0x18   :  { %147 = vmatpush1.msra.mxu0 %v2265_v8  ;;  %1765 = vmatpush3.msra.mxu1 %v2294_v18  ;;  %v2310_v23 = vld [vmem:[#allocation3 + $0x130] sm:$0xff]  ;;  %v2320_v26 = vld [vmem:[#allocation3 + $0x118] sm:$0xff]  ;;  %v2327_v28 = vld [vmem:[#allocation3 + $0x80] sm:$0xff] }
  0x19   :  { %148 = vmatprep.subr.mxu0 %v2268_v9  ;;  %1766 = vmatprep.subr.mxu1 %v3119_v1  ;;  %v2323_v27 = vld [vmem:[#allocation3 + $0x90] sm:$0xff]  ;;  %v2330_v29 = vld [vmem:[#allocation3 + $0x100] sm:$0xff]  ;;  %v2333_v30 = vld [vmem:[#allocation3 + $0x78] sm:$0xff] }
  0x1a   :  { %149 = vmatpush1.msra.mxu0 %v2271_v10  ;;  %1767 = vmatpush3.msra.mxu1 %v2300_v20  ;;  %v2337_v31 = vld [vmem:[#allocation3 + $0x68] sm:$0xff]  ;;  %v2343_v33 = vld [vmem:[#allocation3 + $0x60] sm:$0xff]  ;;  %v2347_v34 = vld [vmem:[#allocation3 + $0x50] sm:$0xff] }
  0x1b   :  { %150 = vmatprep.subr.mxu0 %v2274_v11  ;;  %1768 = vmatprep.subr.mxu1 %v3119_v1  ;;  %v2340_v32 = vld [vmem:[#allocation3 + $0xe8] sm:$0xff]  ;;  %v2350_v36 = vld [vmem:[#allocation3 + $0xd0] sm:$0xff]  ;;  %v2357_v38 = vld [vmem:[#allocation3 + $0x38] sm:$0xff] }
  0x1c   :  { %151 = vmatpush1.msra.mxu0 %v2277_v12  ;;  %1769 = vmatpush3.msra.mxu1 %v2310_v23  ;;  %v2353_v37 = vld [vmem:[#allocation3 + $0x48] sm:$0xff]  ;;  %v2360_v39 = vld [vmem:[#allocation3 + $0xb8] sm:$0xff]  ;;  %v2363_v40 = vld [vmem:[#allocation3 + $0x30] sm:$0xff] }
  0x1d   :  { %152 = vmatprep.subr.mxu0 %v2280_v13  ;;  %1770 = vmatprep.subr.mxu1 %v3119_v1  ;;  %v2367_v41 = vld [vmem:[#allocation3 + $0x20] sm:$0xff]  ;;  %v2376_v44 = vld [vmem:[#allocation3 + $0x18] sm:$0xff]  ;;  %v2380_v45 = vld [vmem:[#allocation3 + $0x8] sm:$0xff] }
  0x1e   :  { %153 = vmatpush1.msra.mxu0 %v2283_v14  ;;  %1771 = vmatpush3.msra.mxu1 %v2320_v26  ;;  %3151 = vst [vmem:[#allocation7_spill] sm:$0xff] %v2367_v41  ;;  %v2373_v43 = vld [vmem:[#allocation3 + $0xa0] sm:$0xff]  ;;  %3152 = vst [vmem:[#allocation8_spill] sm:$0xff] %v2376_v44  ;;  %v2383_v46 = vld [vmem:[#allocation3 + $0x88] sm:$0xff] }
  0x1f   :  { %154 = vmatprep.subr.mxu0 %v2286_v15  ;;  %1772 = vmatprep.subr.mxu1 %v3119_v1  ;;  %3153 = vst [vmem:[#allocation9_spill] sm:$0xff] %v2380_v45  ;;  %v2386_v47 = vld [vmem:[#allocation3] sm:$0xff]  ;;  %v2392_v48 = vld [vmem:[#allocation3 + $0x70] sm:$0xff]  ;;  %v2401_v50 = vld [vmem:[#allocation3 + $0x58] sm:$0xff] }
  0x20   :  { %155 = vmatpush1.msra.mxu0 %v2291_v17  ;;  %1773 = vmatpush3.msra.mxu1 %v2330_v29  ;;  %3154 = vst [vmem:[#allocation10_spill] sm:$0xff] %v2386_v47  ;;  %v39_v49 = vld [vmem:[%s3112_s0] sm:$0xff]  ;;  %v2412_v53 = vld [vmem:[#allocation3 + $0x28] sm:$0xff]  ;;  %v2418_v54 = vld [vmem:[#allocation3 + $0x10] sm:$0xff] }
  0x21   :  { %156 = vmatprep.subr.mxu0 %v2297_v19  ;;  %1774 = vmatprep.subr.mxu1 %v3119_v1  ;;  %v2407_v52 = vld [vmem:[#allocation3 + $0x40] sm:$0xff]  ;;  %3156 = vst [vmem:[#allocation12_spill] sm:$0xff] %v2412_v53  ;;  %3157 = vst [vmem:[#allocation13_spill] sm:$0xff] %v2418_v54 }
  0x22   :  { %157 = vmatpush1.msra.mxu0 %v2303_v21  ;;  %1775 = vmatpush3.msra.mxu1 %v2340_v32  ;;  %3155 = vst [vmem:[#allocation11_spill] sm:$0xff] %v2407_v52  ;;  %v40_v57 = vld [vmem:[%s3113_s1] sm:$0x7] }
  0x23   :  { %158 = vmatprep.subr.mxu0 %v2307_v22  ;;  %1776 = vmatprep.subr.mxu1 %v3119_v1  ;;  %v101_v58 = vrot.slane %v40_v57, %v2495_v56  ;;  %v89_v59 = vld [vmem:[%s3115_s3] sm:$0x7]  ;;  %v105_v0 = vrot.slane %v40_v57, %v2505_v61 }
  0x24   :  { %159 = vmatpush1.msra.mxu0 %v2313_v24  ;;  %1777 = vmatpush3.msra.mxu1 %v2350_v36  ;;  %v120_v62 = vrot.slane %v89_v59, %v2495_v56 }
  0x25   :  { %160 = vmatprep.subr.mxu0 %v2317_v25  ;;  %1778 = vmatprep.subr.mxu1 %v3119_v1  ;;  %v3164_v42 = vld [vmem:[#allocation8_spill] sm:$0xff] }
  0x26   :  { %161 = vmatpush1.msra.mxu0 %v2323_v27  ;;  %1779 = vmatpush3.msra.mxu1 %v2360_v39 }
  0x27   :  { %162 = vmatprep.subr.mxu0 %v2327_v28  ;;  %1780 = vmatprep.subr.mxu1 %v3119_v1 }
  0x28   :  { %163 = vmatpush1.msra.mxu0 %v2333_v30  ;;  %1781 = vmatpush3.msra.mxu1 %v2373_v43 }
  0x29   :  { %164 = vmatprep.subr.mxu0 %v2337_v31  ;;  %1782 = vmatprep.subr.mxu1 %v3119_v1 }
  0x2a   :  { %165 = vmatpush1.msra.mxu0 %v2343_v33  ;;  %1783 = vmatpush3.msra.mxu1 %v2383_v46 }
  0x2b   :  { %166 = vmatprep.subr.mxu0 %v2347_v34  ;;  %1784 = vmatprep.subr.mxu1 %v3119_v1 }
  0x2c   :  { %167 = vmatpush1.msra.mxu0 %v2353_v37  ;;  %1785 = vmatpush3.msra.mxu1 %v2392_v48 }
  0x2d   :  { %168 = vmatprep.subr.mxu0 %v2357_v38  ;;  %1786 = vmatprep.subr.mxu1 %v3119_v1 }
  0x2e   :  { %169 = vmatpush1.msra.mxu0 %v2363_v40  ;;  %94 = vperm.xlu0 %2049, %v39_v49   ;;  %v124_v49 = vrot.slane %v89_v59, %v2505_v61 }
  0x2f   :  { %170 = vmatprep.subr.mxu0 %v2367_v41  ;;  %1787 = vmatpush3.msra.mxu1 %v2401_v50 }
  0x30   :  { %171 = vmatpush1.msra.mxu0 %v2376_v44  ;;  %1788 = vmatprep.subr.mxu1 %v3119_v1 }
  0x31   :  { %172 = vmatprep.subr.mxu0 %v2380_v45  ;;  %1789 = vmatpush3.msra.mxu1 %v2407_v52 }
  0x32   :  { %173 = vmatpush1.msra.mxu0 %v2386_v47  ;;  %1790 = vmatprep.subr.mxu1 %v3119_v1 }
  0x33   :  { %1606 = vmatmul.mubr.msk.f32.vlgmr.msra.gmra.mxu0 %vm137_vm1, %v2206_v51  ;;  %310 = vmatprep.subr.mxu0 %v2252_v3 }
  0x34   :  { %311 = vmatpush1.msra.mxu0 %v2254_v4  ;;  %1791 = vmatpush3.msra.mxu1 %v2412_v53 }
  0x35   :  { %312 = vmatprep.subr.mxu0 %v2256_v5  ;;  %1792 = vmatprep.subr.mxu1 %v3119_v1 }
  0x36   :  { %313 = vmatpush1.msra.mxu0 %v2259_v6  ;;  %1793 = vmatpush3.msra.mxu1 %v2418_v54 }
  0x37   :  { %314 = vmatprep.subr.mxu0 %v2262_v7  ;;  %1795 = vmatmul.mubr.msk.f32.vlgmr.msra.gmra.mxu1 %vm137_vm1, %v2206_v51 }
  0x38   :  { %315 = vmatpush1.msra.mxu0 %v2265_v8  ;;  %1797 = vmatprep.subr.mxu1 %v3119_v1 }
  0x39   :  { %316 = vmatprep.subr.mxu0 %v2268_v9  ;;  %1798 = vmatpush3.msra.mxu1 %v2288_v16 }
  0x3a   :  { %317 = vmatpush1.msra.mxu0 %v2271_v10  ;;  %1799 = vmatprep.subr.mxu1 %v3119_v1 }
  0x3b   :  { %318 = vmatprep.subr.mxu0 %v2274_v11  ;;  %1800 = vmatpush3.msra.mxu1 %v2294_v18 }
  0x3c   :  { %319 = vmatpush1.msra.mxu0 %v2277_v12  ;;  %1801 = vmatprep.subr.mxu1 %v3119_v1 }
  0x3d   :  { %320 = vmatprep.subr.mxu0 %v2280_v13  ;;  %1802 = vmatpush3.msra.mxu1 %v2300_v20 }
  0x3e   :  { %321 = vmatpush1.msra.mxu0 %v2283_v14  ;;  %1803 = vmatprep.subr.mxu1 %v3119_v1 }
  0x3f   :  { %322 = vmatprep.subr.mxu0 %v2286_v15  ;;  %1804 = vmatpush3.msra.mxu1 %v2310_v23 }
  0x40   :  { %323 = vmatpush1.msra.mxu0 %v2291_v17  ;;  %1805 = vmatprep.subr.mxu1 %v3119_v1 }
  0x41   :  { %324 = vmatprep.subr.mxu0 %v2297_v19  ;;  %1806 = vmatpush3.msra.mxu1 %v2320_v26 }
  0x42   :  { %325 = vmatpush1.msra.mxu0 %v2303_v21  ;;  %1807 = vmatprep.subr.mxu1 %v3119_v1 }
  0x43   :  { %326 = vmatprep.subr.mxu0 %v2307_v22  ;;  %1808 = vmatpush3.msra.mxu1 %v2330_v29 }
  0x44   :  { %327 = vmatpush1.msra.mxu0 %v2313_v24  ;;  %1809 = vmatprep.subr.mxu1 %v3119_v1 }
  0x45   :  { %328 = vmatprep.subr.mxu0 %v2317_v25  ;;  %1810 = vmatpush3.msra.mxu1 %v2340_v32 }
  0x46   :  { %329 = vmatpush1.msra.mxu0 %v2323_v27  ;;  %1811 = vmatprep.subr.mxu1 %v3119_v1 }
  0x47   :  { %330 = vmatprep.subr.mxu0 %v2327_v28  ;;  %1812 = vmatpush3.msra.mxu1 %v2350_v36 }
  0x48   :  { %331 = vmatpush1.msra.mxu0 %v2333_v30  ;;  %1813 = vmatprep.subr.mxu1 %v3119_v1 }
  0x49   :  { %332 = vmatprep.subr.mxu0 %v2337_v31  ;;  %1814 = vmatpush3.msra.mxu1 %v2360_v39 }
  0x4a   :  { %333 = vmatpush1.msra.mxu0 %v2343_v33  ;;  %1815 = vmatprep.subr.mxu1 %v3119_v1 }
  0x4b   :  { %334 = vmatprep.subr.mxu0 %v2347_v34  ;;  %1816 = vmatpush3.msra.mxu1 %v2373_v43 }
  0x4c   :  { %335 = vmatpush1.msra.mxu0 %v2353_v37  ;;  %1817 = vmatprep.subr.mxu1 %v3119_v1 }
  0x4d   :  { %336 = vmatprep.subr.mxu0 %v2357_v38  ;;  %1818 = vmatpush3.msra.mxu1 %v2383_v46 }
  0x4e   :  { %337 = vmatpush1.msra.mxu0 %v2363_v40  ;;  %1819 = vmatprep.subr.mxu1 %v3119_v1 }
  0x4f   :  { %338 = vmatprep.subr.mxu0 %v2367_v41  ;;  %1820 = vmatpush3.msra.mxu1 %v2392_v48 }
  0x50   :  { %339 = vmatpush1.msra.mxu0 %v2376_v44  ;;  %1821 = vmatprep.subr.mxu1 %v3119_v1 }
  0x51   :  { %340 = vmatprep.subr.mxu0 %v2380_v45  ;;  %1822 = vmatpush3.msra.mxu1 %v2401_v50 }
  0x52   :  { %341 = vmatpush1.msra.mxu0 %v2386_v47  ;;  %1823 = vmatprep.subr.mxu1 %v3119_v1 }
  0x53   :  { %374 = vmatprep.mubr.f32.mxu0 %v3119_v1  ;;  %1824 = vmatpush3.msra.mxu1 %v2407_v52 }
  0x54   :  { %1829 = vmatprep.mubr.msk.f32.mxu1 %vm2204_vm0, %v3119_v1  ;;  %1825 = vmatprep.subr.mxu1 %v3119_v1 }
  0x55   :  { %493 = vmatprep.subr.mxu0 %v2252_v3  ;;  %1826 = vmatpush3.msra.mxu1 %v2412_v53 }
  0x56   :  { %1827 = vmatprep.subr.mxu1 %v3119_v1 }
  0x57   :  { %1828 = vmatpush3.msra.mxu1 %v2418_v54 }
  0x58   :  { %1832 = vmatprep.subr.mxu1 %v3119_v1 }
  0xa9   :  { %v95_v60 = vpop.permute.xlu0 %94 }
  0xaa   :  { %v113_v63 = vmul.f32 %v101_v58, %v95_v60  ;;  %v114_v51 = vmul.f32 %v105_v0, %v95_v60 }
  0xac   :  { %v2509_v2 = vadd.f32 %v120_v62, %v113_v63  ;;  %v2513_v47 = vadd.f32 %v124_v49, %v114_v51  ;;  %v2517_v63 = vsub.s32 2, %v2492_v55 }
  0xae   :  { %3161 = vst [vmem:[#allocation17_spill] sm:$0xff] %v2513_v47  ;;  %3162 = vst [vmem:[#allocation18_spill] sm:$0xff] %v2517_v63  ;;  %v109_v0 = vrot.slane %v40_v57, %v2517_v63 }
  0xb0   :  { %v115_v49 = vmul.f32 %v109_v0, %v95_v60  ;;  %v3168_v60 = vld [vmem:[#allocation13_spill] sm:$0xff]  ;;  %v3169_v0 = vld [vmem:[#allocation6_spill] sm:$0xff] }
  0xf3   :  { %v208_v35 = vpop.f32.mrf.mxu0 }
  0xf4   :  { %v283_v1 = vadd.f32 %v208_v35, %v2509_v2 }
  0xf5   :  { %v210_v54 = vpop.f32.mrf.mxu0 }
  0xf6   :  { %v1608_v3 = vmul.f32 -1.442695, %v283_v1  ;;  %v284_v45 = vadd.f32 %v210_v54, %v2513_v47  ;;  %v128_v1 = vrot.slane %v89_v59, %v2517_v63 }
  0xf7   :  { %v279_v53 = vpop.f32.mrf.mxu1 }
  0xf8   :  { %2050 = vpow2.f32 %v1608_v3  ;;  %v1609_v56 = vmul.f32 -1.442695, %v284_v45  ;;  %v2521_v61 = vadd.f32 %v128_v1, %v115_v49 }
  0xf9   :  { %v1796_v58 = vpop.f32.mrf.mxu1 }
  0xfa   :  { %2052 = vpow2.f32 %v1609_v56  ;;  %v3163_v56 = vmov 0.0  }
  0xfb   :  { %v1605_v58 = vsel %vm137_vm1, 1.0, %v3163_v56 }
 0x105   :  { %v2051_v44 = vpop.eup %2050 }
 0x106   :  { %v291_v62 = vadd.f32 1.0, %v2051_v44 }
 0x107   :  { %v2053_v35 = vpop.eup %2052 }
 0x108   :  { %2054 = vrcp.f32 %v291_v62  ;;  %v292_v51 = vadd.f32 1.0, %v2053_v35 }
 0x10a   :  { %2056 = vrcp.f32 %v292_v51 }
 0x115   :  { %v2055_v3 = vpop.eup %2054 }
 0x116   :  { %v297_v45 = vmul.f32 %v2055_v3, %v279_v53  ;;  %v3166_v53 = vld [vmem:[#allocation9_spill] sm:$0xff] }
 0x117   :  { %v2057_v44 = vpop.eup %2056 }
 0x118   :  { %v298_v54 = vadd.f32 %v297_v45, %v2521_v61  ;;  %v300_v62 = vsub.f32 1.0, %v2057_v44  ;;  %v302_v47 = vmul.f32 %v2057_v44, %v1605_v58  ;;  %v3170_v58 = vld [vmem:[#allocation17_spill] sm:$0xff] }
 0x11a   :  { %2058 = vtanh.f32 %v298_v54 }
 0x127   :  { %v2059_v57 = vpop.eup %2058 }
 0x128   :  { %v301_v55 = vmul.f32 %v2059_v57, %v300_v62 }
 0x12a   :  { %v2527_v59 = vadd.f32 %v302_v47, %v301_v55  ;;  %v3165_v47 = vld [vmem:[#allocation12_spill] sm:$0xff]  ;;  %v3167_v55 = vld [vmem:[#allocation10_spill] sm:$0xff] }
 0x12c   :  { %375 = vmatmul.mubr.f32.vlgmr.msra.gmra.mxu0 %v2527_v59  ;;  %1830 = vmatmul.mubr.f32.vlgmr.msra.gmra.mxu1 %v2527_v59 }
 0x12d   :  { %494 = vmatpush1.msra.mxu0 %v2254_v4  ;;  %1833 = vmatpush3.msra.mxu1 %v2288_v16 }
 0x12e   :  { %495 = vmatprep.subr.mxu0 %v2256_v5  ;;  %1834 = vmatprep.subr.mxu1 %v3163_v56 }
 0x12f   :  { %496 = vmatpush1.msra.mxu0 %v2259_v6  ;;  %1835 = vmatpush3.msra.mxu1 %v2294_v18 }
 0x130   :  { %497 = vmatprep.subr.mxu0 %v2262_v7  ;;  %1836 = vmatprep.subr.mxu1 %v3163_v56 }
 0x131   :  { %498 = vmatpush1.msra.mxu0 %v2265_v8  ;;  %1837 = vmatpush3.msra.mxu1 %v2300_v20 }
 0x132   :  { %499 = vmatprep.subr.mxu0 %v2268_v9  ;;  %1838 = vmatprep.subr.mxu1 %v3163_v56 }
 0x133   :  { %500 = vmatpush1.msra.mxu0 %v2271_v10  ;;  %1839 = vmatpush3.msra.mxu1 %v2310_v23 }
 0x134   :  { %501 = vmatprep.subr.mxu0 %v2274_v11  ;;  %1840 = vmatprep.subr.mxu1 %v3163_v56 }
 0x135   :  { %502 = vmatpush1.msra.mxu0 %v2277_v12  ;;  %1841 = vmatpush3.msra.mxu1 %v2320_v26 }
 0x136   :  { %503 = vmatprep.subr.mxu0 %v2280_v13  ;;  %1842 = vmatprep.subr.mxu1 %v3163_v56 }
 0x137   :  { %504 = vmatpush1.msra.mxu0 %v2283_v14  ;;  %1843 = vmatpush3.msra.mxu1 %v2330_v29 }
 0x138   :  { %505 = vmatprep.subr.mxu0 %v2286_v15  ;;  %1844 = vmatprep.subr.mxu1 %v3163_v56 }
 0x139   :  { %506 = vmatpush1.msra.mxu0 %v2291_v17  ;;  %1845 = vmatpush3.msra.mxu1 %v2340_v32 }
 0x13a   :  { %507 = vmatprep.subr.mxu0 %v2297_v19  ;;  %1846 = vmatprep.subr.mxu1 %v3163_v56 }
 0x13b   :  { %508 = vmatpush1.msra.mxu0 %v2303_v21  ;;  %1847 = vmatpush3.msra.mxu1 %v2350_v36 }
 0x13c   :  { %509 = vmatprep.subr.mxu0 %v2307_v22  ;;  %1848 = vmatprep.subr.mxu1 %v3163_v56 }
 0x13d   :  { %510 = vmatpush1.msra.mxu0 %v2313_v24  ;;  %1849 = vmatpush3.msra.mxu1 %v2360_v39 }
 0x13e   :  { %511 = vmatprep.subr.mxu0 %v2317_v25  ;;  %1850 = vmatprep.subr.mxu1 %v3163_v56 }
 0x13f   :  { %512 = vmatpush1.msra.mxu0 %v2323_v27  ;;  %1851 = vmatpush3.msra.mxu1 %v2373_v43 }
 0x140   :  { %513 = vmatprep.subr.mxu0 %v2327_v28  ;;  %1852 = vmatprep.subr.mxu1 %v3163_v56 }
 0x141   :  { %514 = vmatpush1.msra.mxu0 %v2333_v30  ;;  %1853 = vmatpush3.msra.mxu1 %v2383_v46 }
 0x142   :  { %515 = vmatprep.subr.mxu0 %v2337_v31  ;;  %1854 = vmatprep.subr.mxu1 %v3163_v56 }
 0x143   :  { %516 = vmatpush1.msra.mxu0 %v2343_v33  ;;  %1855 = vmatpush3.msra.mxu1 %v2392_v48 }
 0x144   :  { %517 = vmatprep.subr.mxu0 %v2347_v34  ;;  %1856 = vmatprep.subr.mxu1 %v3163_v56 }
 0x145   :  { %518 = vmatpush1.msra.mxu0 %v2353_v37  ;;  %1857 = vmatpush3.msra.mxu1 %v2401_v50 }
 0x146   :  { %519 = vmatprep.subr.mxu0 %v2357_v38  ;;  %1858 = vmatprep.subr.mxu1 %v3163_v56 }
 0x147   :  { %520 = vmatpush1.msra.mxu0 %v2363_v40  ;;  %1859 = vmatpush3.msra.mxu1 %v2407_v52 }
 0x148   :  { %521 = vmatprep.subr.mxu0 %v2367_v41  ;;  %1860 = vmatprep.subr.mxu1 %v3163_v56 }
 0x149   :  { %522 = vmatpush1.msra.mxu0 %v3164_v42  ;;  %1861 = vmatpush3.msra.mxu1 %v3165_v47 }
 0x14a   :  { %523 = vmatprep.subr.mxu0 %v3166_v53  ;;  %1862 = vmatprep.subr.mxu1 %v3163_v56 }
 0x14b   :  { %524 = vmatpush1.msra.mxu0 %v3167_v55  ;;  %557 = vmatprep.mubr.f32.mxu0 %v3163_v56 }
 0x14c   :  { %1863 = vmatpush3.msra.mxu1 %v3168_v60  ;;  %1864 = vmatprep.mubr.msk.f32.mxu1 %vm2204_vm0, %v3163_v56 }
 0x14d   :  { %675 = vmatprep.subr.mxu0 %v3169_v0  ;;  %1867 = vmatprep.subr.mxu1 %v3163_v56 }
 0x1ec   :  { %v376_v35 = vpop.f32.mrf.mxu0  ;;  %v447_v1 = vpop.f32.mrf.mxu1 }
 0x1ed   :  { %v453_v49 = vrot.slane %v376_v35, 7  ;;  %v472_v53 = vrot.slane %v447_v1, 7 }
 0x1ee   :  { %v378_v51 = vpop.f32.mrf.mxu0  ;;  %v1831_v3 = vpop.f32.mrf.mxu1 }
 0x1ef   :  { %v457_v45 = vadd.f32 %v453_v49, %v2509_v2  ;;  %v454_v44 = vrot.slane %v378_v51, 7  ;;  %v480_v51 = vrot.slane %v2527_v59, 7 }
 0x1f1   :  { %v1610_v54 = vmul.f32 -1.442695, %v457_v45  ;;  %v458_v62 = vadd.f32 %v454_v44, %v3170_v58 }
 0x1f3   :  { %2060 = vpow2.f32 %v1610_v54  ;;  %v1611_v57 = vmul.f32 -1.442695, %v458_v62  ;;  %v3171_v62 = vld [vmem:[#allocation15_spill] sm:$0xff] }
 0x1f5   :  { %2062 = vpow2.f32 %v1611_v57  ;;  %v3175_v57 = vld [vmem:[#allocation12_spill] sm:$0xff] }
 0x200   :  { %v2061_v63 = vpop.eup %2060 }
 0x201   :  { %v465_v60 = vadd.f32 1.0, %v2061_v63  ;;  %v308_v63 = vrot.slane %v2527_v59, %v3171_v62  ;;  %v3174_v59 = vld [vmem:[#allocation8_spill] sm:$0xff] }
 0x202   :  { %v2063_v0 = vpop.eup %2062 }
 0x203   :  { %2064 = vrcp.f32 %v465_v60  ;;  %v466_v55 = vadd.f32 1.0, %v2063_v0  ;;  %v3172_v60 = vld [vmem:[#allocation14_spill] sm:$0xff] }
 0x204   :  { %vm304_vm2 = vcmp.eq.s32.totalorder %v3172_v60, 0  ;;  %vm484_vm3 = vcmp.eq.s32.totalorder %v3172_v60, 1  ;;  %vm666_vm4 = vcmp.eq.s32.totalorder %v3172_v60, 2  ;;  %vm848_vm5 = vcmp.eq.s32.totalorder %v3172_v60, 3 }
 0x205   :  { %2066 = vrcp.f32 %v466_v55  ;;  %v309_v55 = vsel %vm304_vm2, %v308_v63, 0.0  ;;  %vm1030_vm6 = vcmp.eq.s32.totalorder %v3172_v60, 4  ;;  %vm1212_vm7 = vcmp.eq.s32.totalorder %v3172_v60, 5 }
 0x206   :  { %vm1394_vm8 = vcmp.eq.s32.totalorder %v3172_v60, 6  ;;  %vm1576_vm9 = vcmp.eq.s32.totalorder %v3172_v60, 7 }
 0x210   :  { %v2065_v47 = vpop.eup %2064 }
 0x211   :  { %v474_v42 = vmul.f32 %v2065_v47, %v472_v53  ;;  %v3173_v47 = vld [vmem:[#allocation16_spill] sm:$0xff] }
 0x212   :  { %v2067_v49 = vpop.eup %2066 }
 0x213   :  { %v475_v35 = vadd.f32 %v474_v42, %v2521_v61  ;;  %v477_v3 = vsub.f32 1.0, %v2067_v49  ;;  %v482_v44 = vmul.f32 %v2067_v49, %v480_v51  ;;  %v3177_v49 = vld [vmem:[#allocation10_spill] sm:$0xff]  ;;  %v3178_v51 = vld [vmem:[#allocation13_spill] sm:$0xff] }
 0x215   :  { %2068 = vtanh.f32 %v475_v35  ;;  %v3176_v35 = vld [vmem:[#allocation9_spill] sm:$0xff] }
 0x222   :  { %v2069_v45 = vpop.eup %2068 }
 0x223   :  { %v478_v54 = vmul.f32 %v2069_v45, %v477_v3  ;;  %v3179_v3 = vld [vmem:[#allocation6_spill] sm:$0xff] }
 0x225   :  { %v2605_v0 = vadd.f32 %v482_v44, %v478_v54 }
 0x227   :  { %v488_v42 = vrot.slane %v2605_v0, %v3173_v47  ;;  %v491_v53 = vrot.slane %v2605_v0, 1 }
 0x229   :  { %558 = vmatmul.mubr.f32.vlgmr.msra.gmra.mxu0 %v491_v53  ;;  %1865 = vmatmul.mubr.f32.vlgmr.msra.gmra.mxu1 %v491_v53  ;;  %v2611_v1 = vsel %vm484_vm3, %v488_v42, %v309_v55 }
 0x22a   :  { %676 = vmatpush1.msra.mxu0 %v2254_v4  ;;  %1868 = vmatpush3.msra.mxu1 %v2288_v16 }
 0x22b   :  { %677 = vmatprep.subr.mxu0 %v2256_v5  ;;  %1869 = vmatprep.subr.mxu1 %v3163_v56 }
 0x22c   :  { %678 = vmatpush1.msra.mxu0 %v2259_v6  ;;  %1870 = vmatpush3.msra.mxu1 %v2294_v18 }
 0x22d   :  { %679 = vmatprep.subr.mxu0 %v2262_v7  ;;  %1871 = vmatprep.subr.mxu1 %v3163_v56 }
 0x22e   :  { %680 = vmatpush1.msra.mxu0 %v2265_v8  ;;  %1872 = vmatpush3.msra.mxu1 %v2300_v20 }
 0x22f   :  { %681 = vmatprep.subr.mxu0 %v2268_v9  ;;  %1873 = vmatprep.subr.mxu1 %v3163_v56 }
 0x230   :  { %682 = vmatpush1.msra.mxu0 %v2271_v10  ;;  %1874 = vmatpush3.msra.mxu1 %v2310_v23 }
 0x231   :  { %683 = vmatprep.subr.mxu0 %v2274_v11  ;;  %1875 = vmatprep.subr.mxu1 %v3163_v56 }
 0x232   :  { %684 = vmatpush1.msra.mxu0 %v2277_v12  ;;  %1876 = vmatpush3.msra.mxu1 %v2320_v26 }
 0x233   :  { %685 = vmatprep.subr.mxu0 %v2280_v13  ;;  %1877 = vmatprep.subr.mxu1 %v3163_v56 }
 0x234   :  { %686 = vmatpush1.msra.mxu0 %v2283_v14  ;;  %1878 = vmatpush3.msra.mxu1 %v2330_v29 }
 0x235   :  { %687 = vmatprep.subr.mxu0 %v2286_v15  ;;  %1879 = vmatprep.subr.mxu1 %v3163_v56 }
 0x236   :  { %688 = vmatpush1.msra.mxu0 %v2291_v17  ;;  %1880 = vmatpush3.msra.mxu1 %v2340_v32 }
 0x237   :  { %689 = vmatprep.subr.mxu0 %v2297_v19  ;;  %1881 = vmatprep.subr.mxu1 %v3163_v56 }
 0x238   :  { %690 = vmatpush1.msra.mxu0 %v2303_v21  ;;  %1882 = vmatpush3.msra.mxu1 %v2350_v36 }
 0x239   :  { %691 = vmatprep.subr.mxu0 %v2307_v22  ;;  %1883 = vmatprep.subr.mxu1 %v3163_v56 }
 0x23a   :  { %692 = vmatpush1.msra.mxu0 %v2313_v24  ;;  %1884 = vmatpush3.msra.mxu1 %v2360_v39 }
 0x23b   :  { %693 = vmatprep.subr.mxu0 %v2317_v25  ;;  %1885 = vmatprep.subr.mxu1 %v3163_v56 }
 0x23c   :  { %694 = vmatpush1.msra.mxu0 %v2323_v27  ;;  %1886 = vmatpush3.msra.mxu1 %v2373_v43 }
 0x23d   :  { %695 = vmatprep.subr.mxu0 %v2327_v28  ;;  %1887 = vmatprep.subr.mxu1 %v3163_v56 }
 0x23e   :  { %696 = vmatpush1.msra.mxu0 %v2333_v30  ;;  %1888 = vmatpush3.msra.mxu1 %v2383_v46 }
 0x23f   :  { %697 = vmatprep.subr.mxu0 %v2337_v31  ;;  %1889 = vmatprep.subr.mxu1 %v3163_v56 }
 0x240   :  { %698 = vmatpush1.msra.mxu0 %v2343_v33  ;;  %1890 = vmatpush3.msra.mxu1 %v2392_v48 }
 0x241   :  { %699 = vmatprep.subr.mxu0 %v2347_v34  ;;  %1891 = vmatprep.subr.mxu1 %v3163_v56 }
 0x242   :  { %700 = vmatpush1.msra.mxu0 %v2353_v37  ;;  %1892 = vmatpush3.msra.mxu1 %v2401_v50 }
 0x243   :  { %701 = vmatprep.subr.mxu0 %v2357_v38  ;;  %1893 = vmatprep.subr.mxu1 %v3163_v56 }
 0x244   :  { %702 = vmatpush1.msra.mxu0 %v2363_v40  ;;  %1894 = vmatpush3.msra.mxu1 %v2407_v52 }
 0x245   :  { %703 = vmatprep.subr.mxu0 %v2367_v41  ;;  %1895 = vmatprep.subr.mxu1 %v3163_v56 }
 0x246   :  { %704 = vmatpush1.msra.mxu0 %v3174_v59  ;;  %1896 = vmatpush3.msra.mxu1 %v3175_v57 }
 0x247   :  { %705 = vmatprep.subr.mxu0 %v3176_v35  ;;  %1897 = vmatprep.subr.mxu1 %v3163_v56 }
 0x248   :  { %706 = vmatpush1.msra.mxu0 %v3177_v49  ;;  %739 = vmatprep.mubr.f32.mxu0 %v3163_v56 }
 0x249   :  { %1898 = vmatpush3.msra.mxu1 %v3178_v51  ;;  %1899 = vmatprep.mubr.msk.f32.mxu1 %vm2204_vm0, %v3163_v56 }
 0x24a   :  { %857 = vmatprep.subr.mxu0 %v3179_v3  ;;  %1902 = vmatprep.subr.mxu1 %v3163_v56 }
 0x2e9   :  { %v559_v45 = vpop.f32.mrf.mxu0  ;;  %v630_v54 = vpop.f32.mrf.mxu1 }
 0x2ea   :  { %v636_v44 = vrot.slane %v559_v45, 6  ;;  %v655_v59 = vrot.slane %v630_v54, 6  ;;  %v2776_v54 = vld [vmem:[#allocation3 + $0x178] sm:$0xff] }
 0x2eb   :  { %v561_v62 = vpop.f32.mrf.mxu0  ;;  %v1866_v63 = vpop.f32.mrf.mxu1 }
 0x2ec   :  { %v640_v47 = vadd.f32 %v636_v44, %v2509_v2  ;;  %v637_v53 = vrot.slane %v561_v62, 6  ;;  %v662_v62 = vrot.slane %v2605_v0, 7 }
 0x2ee   :  { %v1612_v42 = vmul.f32 -1.442695, %v640_v47  ;;  %v641_v55 = vadd.f32 %v637_v53, %v3170_v58 }
 0x2f0   :  { %2070 = vpow2.f32 %v1612_v42  ;;  %v1613_v51 = vmul.f32 -1.442695, %v641_v55  ;;  %v2779_v55 = vld [vmem:[#allocation3 + $0x158] sm:$0xff] }
 0x2f2   :  { %2072 = vpow2.f32 %v1613_v51 }
 0x2fd   :  { %v2071_v49 = vpop.eup %2070 }
 0x2fe   :  { %v648_v35 = vadd.f32 1.0, %v2071_v49 }
 0x2ff   :  { %v2073_v3 = vpop.eup %2072 }
 0x300   :  { %2074 = vrcp.f32 %v648_v35  ;;  %v649_v57 = vadd.f32 1.0, %v2073_v3  ;;  %v3180_v35 = vld [vmem:[#allocation18_spill] sm:$0xff]  ;;  %v2773_v3 = vld [vmem:[#allocation3 + $0x168] sm:$0xff] }
 0x302   :  { %2076 = vrcp.f32 %v649_v57 }
 0x30d   :  { %v2075_v41 = vpop.eup %2074 }
 0x30e   :  { %v657_v52 = vmul.f32 %v2075_v41, %v655_v59 }
 0x30f   :  { %v2077_v44 = vpop.eup %2076 }
 0x310   :  { %v658_v45 = vadd.f32 %v657_v52, %v2521_v61  ;;  %v660_v63 = vsub.f32 1.0, %v2077_v44  ;;  %v664_v53 = vmul.f32 %v2077_v44, %v662_v62  ;;  %v2786_v44 = vld [vmem:[#allocation3 + $0x160] sm:$0xff]  ;;  %v2793_v62 = vld [vmem:[#allocation3 + $0x138] sm:$0xff] }
 0x312   :  { %2078 = vtanh.f32 %v658_v45  ;;  %v2783_v45 = vld [vmem:[#allocation3 + $0x150] sm:$0xff] }
 0x31f   :  { %v2079_v47 = vpop.eup %2078 }
 0x320   :  { %v661_v42 = vmul.f32 %v2079_v47, %v660_v63  ;;  %v2789_v63 = vld [vmem:[#allocation3 + $0x140] sm:$0xff]  ;;  %v2796_v47 = vld [vmem:[#allocation3 + $0x148] sm:$0xff] }
 0x322   :  { %v2684_v51 = vadd.f32 %v664_v53, %v661_v42  ;;  %v2799_v42 = vld [vmem:[#allocation3 + $0x128] sm:$0xff]  ;;  %v2803_v53 = vld [vmem:[#allocation3 + $0x120] sm:$0xff] }
 0x324   :  { %v670_v49 = vrot.slane %v2684_v51, %v3180_v35  ;;  %v673_v41 = vrot.slane %v2684_v51, 2  ;;  %v2809_v35 = vld [vmem:[#allocation3 + $0x110] sm:$0xff] }
 0x326   :  { %740 = vmatmul.mubr.f32.vlgmr.msra.gmra.mxu0 %v673_v41  ;;  %1900 = vmatmul.mubr.f32.vlgmr.msra.gmra.mxu1 %v673_v41  ;;  %v2691_v52 = vsel %vm666_vm4, %v670_v49, %v2611_v1  ;;  %v2813_v49 = vld [vmem:[#allocation3 + $0x108] sm:$0xff]  ;;  %v2816_v41 = vld [vmem:[#allocation3 + $0x118] sm:$0xff] }
 0x327   :  { %858 = vmatpush1.msra.mxu0 %v2254_v4  ;;  %1903 = vmatpush3.msra.mxu1 %v2288_v16  ;;  %v3181_v4 = vld [vmem:[#allocation11_spill] sm:$0xff] }
 0x328   :  { %859 = vmatprep.subr.mxu0 %v2256_v5  ;;  %1904 = vmatprep.subr.mxu1 %v3163_v56  ;;  %v3182_v5 = vld [vmem:[#allocation7_spill] sm:$0xff] }
 0x329   :  { %860 = vmatpush1.msra.mxu0 %v2259_v6  ;;  %1905 = vmatpush3.msra.mxu1 %v2294_v18  ;;  %v3183_v6 = vld [vmem:[#allocation8_spill] sm:$0xff] }
 0x32a   :  { %861 = vmatprep.subr.mxu0 %v2262_v7  ;;  %1906 = vmatprep.subr.mxu1 %v3163_v56  ;;  %v3184_v7 = vld [vmem:[#allocation12_spill] sm:$0xff] }
 0x32b   :  { %862 = vmatpush1.msra.mxu0 %v2265_v8  ;;  %1907 = vmatpush3.msra.mxu1 %v2300_v20  ;;  %v3185_v8 = vld [vmem:[#allocation9_spill] sm:$0xff] }
 0x32c   :  { %863 = vmatprep.subr.mxu0 %v2268_v9  ;;  %1908 = vmatprep.subr.mxu1 %v3163_v56  ;;  %v3186_v9 = vld [vmem:[#allocation10_spill] sm:$0xff] }
 0x32d   :  { %864 = vmatpush1.msra.mxu0 %v2271_v10  ;;  %1909 = vmatpush3.msra.mxu1 %v2310_v23  ;;  %v3187_v10 = vld [vmem:[#allocation13_spill] sm:$0xff] }
 0x32e   :  { %865 = vmatprep.subr.mxu0 %v2274_v11  ;;  %1910 = vmatprep.subr.mxu1 %v3163_v56  ;;  %v3188_v11 = vld [vmem:[#allocation6_spill] sm:$0xff] }
 0x32f   :  { %866 = vmatpush1.msra.mxu0 %v2277_v12  ;;  %1911 = vmatpush3.msra.mxu1 %v2320_v26 }
 0x330   :  { %867 = vmatprep.subr.mxu0 %v2280_v13  ;;  %1912 = vmatprep.subr.mxu1 %v3163_v56 }
 0x331   :  { %868 = vmatpush1.msra.mxu0 %v2283_v14  ;;  %1913 = vmatpush3.msra.mxu1 %v2330_v29 }
 0x332   :  { %869 = vmatprep.subr.mxu0 %v2286_v15  ;;  %1914 = vmatprep.subr.mxu1 %v3163_v56 }
 0x333   :  { %870 = vmatpush1.msra.mxu0 %v2291_v17  ;;  %1915 = vmatpush3.msra.mxu1 %v2340_v32 }
 0x334   :  { %871 = vmatprep.subr.mxu0 %v2297_v19  ;;  %1916 = vmatprep.subr.mxu1 %v3163_v56 }
 0x335   :  { %872 = vmatpush1.msra.mxu0 %v2303_v21  ;;  %1917 = vmatpush3.msra.mxu1 %v2350_v36 }
 0x336   :  { %873 = vmatprep.subr.mxu0 %v2307_v22  ;;  %1918 = vmatprep.subr.mxu1 %v3163_v56 }
 0x337   :  { %874 = vmatpush1.msra.mxu0 %v2313_v24  ;;  %1919 = vmatpush3.msra.mxu1 %v2360_v39 }
 0x338   :  { %875 = vmatprep.subr.mxu0 %v2317_v25  ;;  %1920 = vmatprep.subr.mxu1 %v3163_v56 }
 0x339   :  { %876 = vmatpush1.msra.mxu0 %v2323_v27  ;;  %1921 = vmatpush3.msra.mxu1 %v2373_v43 }
 0x33a   :  { %877 = vmatprep.subr.mxu0 %v2327_v28  ;;  %1922 = vmatprep.subr.mxu1 %v3163_v56 }
 0x33b   :  { %878 = vmatpush1.msra.mxu0 %v2333_v30  ;;  %1923 = vmatpush3.msra.mxu1 %v2383_v46 }
 0x33c   :  { %879 = vmatprep.subr.mxu0 %v2337_v31  ;;  %1924 = vmatprep.subr.mxu1 %v3163_v56 }
 0x33d   :  { %880 = vmatpush1.msra.mxu0 %v2343_v33  ;;  %1925 = vmatpush3.msra.mxu1 %v2392_v48  ;;  %v844_v33 = vrot.slane %v2684_v51, 7  ;;  %v2806_v51 = vld [vmem:[#allocation3 + $0x130] sm:$0xff] }
 0x33e   :  { %881 = vmatprep.subr.mxu0 %v2347_v34  ;;  %1926 = vmatprep.subr.mxu1 %v3163_v56 }
 0x33f   :  { %882 = vmatpush1.msra.mxu0 %v2353_v37  ;;  %1927 = vmatpush3.msra.mxu1 %v2401_v50 }
 0x340   :  { %883 = vmatprep.subr.mxu0 %v2357_v38  ;;  %1928 = vmatprep.subr.mxu1 %v3163_v56 }
 0x341   :  { %884 = vmatpush1.msra.mxu0 %v2363_v40  ;;  %1929 = vmatpush3.msra.mxu1 %v3181_v4  ;;  %v851_v40 = vsub.s32 3, %v3172_v60 }
 0x342   :  { %885 = vmatprep.subr.mxu0 %v3182_v5  ;;  %1930 = vmatprep.subr.mxu1 %v3163_v56  ;;  %v2823_v5 = vld [vmem:[#allocation3 + $0xf0] sm:$0xff] }
 0x343   :  { %886 = vmatpush1.msra.mxu0 %v3183_v6  ;;  %1931 = vmatpush3.msra.mxu1 %v3184_v7  ;;  %v2826_v6 = vld [vmem:[#allocation3 + $0x100] sm:$0xff] }
 0x344   :  { %887 = vmatprep.subr.mxu0 %v3185_v8  ;;  %1932 = vmatprep.subr.mxu1 %v3163_v56  ;;  %v2829_v8 = vld [vmem:[#allocation3 + $0xe0] sm:$0xff] }
 0x345   :  { %888 = vmatpush1.msra.mxu0 %v3186_v9  ;;  %921 = vmatprep.mubr.f32.mxu0 %v3163_v56  ;;  %v2833_v9 = vld [vmem:[#allocation3 + $0xd8] sm:$0xff] }
 0x346   :  { %1933 = vmatpush3.msra.mxu1 %v3187_v10  ;;  %1934 = vmatprep.mubr.msk.f32.mxu1 %vm2204_vm0, %v3163_v56 }
 0x347   :  { %1039 = vmatprep.subr.mxu0 %v3188_v11  ;;  %1937 = vmatprep.subr.mxu1 %v3163_v56  ;;  %v2837_v11 = vld [vmem:[#allocation3 + $0xc8] sm:$0xff] }
 0x3e6   :  { %v741_v12 = vpop.f32.mrf.mxu0  ;;  %v812_v13 = vpop.f32.mrf.mxu1 }
 0x3e7   :  { %v818_v14 = vrot.slane %v741_v12, 5  ;;  %v837_v26 = vrot.slane %v812_v13, 5  ;;  %v2841_v12 = vld [vmem:[#allocation3 + $0xc0] sm:$0xff]  ;;  %v2845_v13 = vld [vmem:[#allocation3 + $0xb0] sm:$0xff] }
 0x3e8   :  { %v743_v15 = vpop.f32.mrf.mxu0  ;;  %v1901_v16 = vpop.f32.mrf.mxu1 }
 0x3e9   :  { %v822_v17 = vadd.f32 %v818_v14, %v2509_v2  ;;  %v819_v19 = vrot.slane %v743_v15, 5  ;;  %v2849_v14 = vld [vmem:[#allocation3 + $0xa8] sm:$0xff]  ;;  %v2857_v15 = vld [vmem:[#allocation3 + $0x90] sm:$0xff]  ;;  %v2865_v16 = vld [vmem:[#allocation3 + $0x78] sm:$0xff] }
 0x3eb   :  { %v1614_v18 = vmul.f32 -1.442695, %v822_v17  ;;  %v823_v20 = vadd.f32 %v819_v19, %v3170_v58  ;;  %v2873_v17 = vld [vmem:[#allocation3 + $0x60] sm:$0xff]  ;;  %v2889_v19 = vld [vmem:[#allocation3 + $0x30] sm:$0xff] }
 0x3ed   :  { %2080 = vpow2.f32 %v1614_v18  ;;  %v1615_v21 = vmul.f32 -1.442695, %v823_v20  ;;  %v2881_v18 = vld [vmem:[#allocation3 + $0x48] sm:$0xff]  ;;  %v2897_v20 = vld [vmem:[#allocation3 + $0x18] sm:$0xff] }
 0x3ee   :  { %3190 = vst [vmem:[#allocation15_spill] sm:$0xff] %v2897_v20 }
 0x3ef   :  { %2082 = vpow2.f32 %v1615_v21  ;;  %v2905_v21 = vld [vmem:[#allocation3] sm:$0xff] }
 0x3f0   :  { %3192 = vst [vmem:[#allocation16_spill] sm:$0xff] %v2905_v21 }
 0x3fa   :  { %v2081_v22 = vpop.eup %2080 }
 0x3fb   :  { %v830_v23 = vadd.f32 1.0, %v2081_v22 }
 0x3fc   :  { %v2083_v24 = vpop.eup %2082 }
 0x3fd   :  { %2084 = vrcp.f32 %v830_v23  ;;  %v831_v25 = vadd.f32 1.0, %v2083_v24 }
 0x3ff   :  { %2086 = vrcp.f32 %v831_v25 }
 0x40a   :  { %v2085_v27 = vpop.eup %2084 }
 0x40b   :  { %v839_v28 = vmul.f32 %v2085_v27, %v837_v26 }
 0x40c   :  { %v2087_v30 = vpop.eup %2086 }
 0x40d   :  { %v840_v29 = vadd.f32 %v839_v28, %v2521_v61  ;;  %v842_v31 = vsub.f32 1.0, %v2087_v30  ;;  %v846_v38 = vmul.f32 %v2087_v30, %v844_v33 }
 0x40f   :  { %2088 = vtanh.f32 %v840_v29 }
 0x41c   :  { %v2089_v34 = vpop.eup %2088 }
 0x41d   :  { %v843_v37 = vmul.f32 %v2089_v34, %v842_v31 }
 0x41f   :  { %v2765_v0 = vadd.f32 %v846_v38, %v843_v37 }
 0x421   :  { %v855_v1 = vrot.slane %v2765_v0, 3  ;;  %v852_v59 = vrot.slane %v2765_v0, %v851_v40 }
 0x423   :  { %922 = vmatmul.mubr.f32.vlgmr.msra.gmra.mxu0 %v855_v1  ;;  %1935 = vmatmul.mubr.f32.vlgmr.msra.gmra.mxu1 %v855_v1  ;;  %v2771_v57 = vsel %vm848_vm5, %v852_v59, %v2691_v52  ;;  %v2819_v52 = vld [vmem:[#allocation3 + $0xf8] sm:$0xff] }
 0x424   :  { %1040 = vmatpush1.msra.mxu0 %v2773_v3  ;;  %1938 = vmatpush3.msra.mxu1 %v2776_v54 }
 0x425   :  { %1041 = vmatprep.subr.mxu0 %v2779_v55  ;;  %1939 = vmatprep.subr.mxu1 %v3163_v56 }
 0x426   :  { %1042 = vmatpush1.msra.mxu0 %v2783_v45  ;;  %1940 = vmatpush3.msra.mxu1 %v2786_v44 }
 0x427   :  { %1043 = vmatprep.subr.mxu0 %v2789_v63  ;;  %1941 = vmatprep.subr.mxu1 %v3163_v56 }
 0x428   :  { %1044 = vmatpush1.msra.mxu0 %v2793_v62  ;;  %1942 = vmatpush3.msra.mxu1 %v2796_v47 }
 0x429   :  { %1045 = vmatprep.subr.mxu0 %v2799_v42  ;;  %1943 = vmatprep.subr.mxu1 %v3163_v56 }
 0x42a   :  { %1046 = vmatpush1.msra.mxu0 %v2803_v53  ;;  %1944 = vmatpush3.msra.mxu1 %v2806_v51 }
 0x42b   :  { %1047 = vmatprep.subr.mxu0 %v2809_v35  ;;  %1945 = vmatprep.subr.mxu1 %v3163_v56 }
 0x42c   :  { %1048 = vmatpush1.msra.mxu0 %v2813_v49  ;;  %1946 = vmatpush3.msra.mxu1 %v2816_v41 }
 0x42d   :  { %1049 = vmatprep.subr.mxu0 %v2819_v52  ;;  %1947 = vmatprep.subr.mxu1 %v3163_v56 }
 0x42e   :  { %1050 = vmatpush1.msra.mxu0 %v2823_v5  ;;  %1948 = vmatpush3.msra.mxu1 %v2826_v6 }
 0x42f   :  { %1051 = vmatprep.subr.mxu0 %v2829_v8  ;;  %1949 = vmatprep.subr.mxu1 %v3163_v56 }
 0x430   :  { %1052 = vmatpush1.msra.mxu0 %v2833_v9  ;;  %1950 = vmatpush3.msra.mxu1 %v2340_v32  ;;  %v2853_v32 = vld [vmem:[#allocation3 + $0x98] sm:$0xff] }
 0x431   :  { %1053 = vmatprep.subr.mxu0 %v2837_v11  ;;  %1951 = vmatprep.subr.mxu1 %v3163_v56 }
 0x432   :  { %1054 = vmatpush1.msra.mxu0 %v2841_v12  ;;  %1952 = vmatpush3.msra.mxu1 %v2350_v36  ;;  %v2861_v36 = vld [vmem:[#allocation3 + $0x80] sm:$0xff] }
 0x433   :  { %1055 = vmatprep.subr.mxu0 %v2845_v13  ;;  %1953 = vmatprep.subr.mxu1 %v3163_v56 }
 0x434   :  { %1056 = vmatpush1.msra.mxu0 %v2849_v14  ;;  %1954 = vmatpush3.msra.mxu1 %v2360_v39  ;;  %v2869_v39 = vld [vmem:[#allocation3 + $0x68] sm:$0xff] }
 0x435   :  { %1057 = vmatprep.subr.mxu0 %v2853_v32  ;;  %1955 = vmatprep.subr.mxu1 %v3163_v56 }
 0x436   :  { %1058 = vmatpush1.msra.mxu0 %v2857_v15  ;;  %1956 = vmatpush3.msra.mxu1 %v2373_v43  ;;  %v2877_v43 = vld [vmem:[#allocation3 + $0x50] sm:$0xff] }
 0x437   :  { %1059 = vmatprep.subr.mxu0 %v2861_v36  ;;  %1957 = vmatprep.subr.mxu1 %v3163_v56 }
 0x438   :  { %1060 = vmatpush1.msra.mxu0 %v2865_v16  ;;  %1958 = vmatpush3.msra.mxu1 %v2383_v46  ;;  %v2885_v46 = vld [vmem:[#allocation3 + $0x38] sm:$0xff] }
 0x439   :  { %1061 = vmatprep.subr.mxu0 %v2869_v39  ;;  %1959 = vmatprep.subr.mxu1 %v3163_v56 }
 0x43a   :  { %1062 = vmatpush1.msra.mxu0 %v2873_v17  ;;  %1960 = vmatpush3.msra.mxu1 %v2392_v48  ;;  %v2893_v48 = vld [vmem:[#allocation3 + $0x20] sm:$0xff] }
 0x43b   :  { %1063 = vmatprep.subr.mxu0 %v2877_v43  ;;  %1961 = vmatprep.subr.mxu1 %v3163_v56  ;;  %3189 = vst [vmem:[#allocation17_spill] sm:$0xff] %v2893_v48 }
 0x43c   :  { %1064 = vmatpush1.msra.mxu0 %v2881_v18  ;;  %1962 = vmatpush3.msra.mxu1 %v2401_v50  ;;  %v2901_v50 = vld [vmem:[#allocation3 + $0x8] sm:$0xff] }
 0x43d   :  { %1065 = vmatprep.subr.mxu0 %v2885_v46  ;;  %1963 = vmatprep.subr.mxu1 %v3163_v56  ;;  %3191 = vst [vmem:[#allocation14_spill] sm:$0xff] %v2901_v50 }
 0x43e   :  { %1066 = vmatpush1.msra.mxu0 %v2889_v19  ;;  %1964 = vmatpush3.msra.mxu1 %v3181_v4  ;;  %v2912_v4 = vld [vmem:[#allocation3 + $0x170] sm:$0xff] }
 0x43f   :  { %1067 = vmatprep.subr.mxu0 %v2893_v48  ;;  %1965 = vmatprep.subr.mxu1 %v3163_v56 }
 0x440   :  { %1068 = vmatpush1.msra.mxu0 %v2897_v20  ;;  %1966 = vmatpush3.msra.mxu1 %v3184_v7 }
 0x441   :  { %1069 = vmatprep.subr.mxu0 %v2901_v50  ;;  %1967 = vmatprep.subr.mxu1 %v3163_v56 }
 0x442   :  { %1070 = vmatpush1.msra.mxu0 %v2905_v21  ;;  %1103 = vmatprep.mubr.f32.mxu0 %v3163_v56 }
 0x443   :  { %1968 = vmatpush3.msra.mxu1 %v3187_v10  ;;  %1969 = vmatprep.mubr.msk.f32.mxu1 %vm2204_vm0, %v3163_v56 }
 0x444   :  { %1221 = vmatprep.subr.mxu0 %v2912_v4  ;;  %1972 = vmatprep.subr.mxu1 %v3163_v56 }
 0x4e3   :  { %v923_v7 = vpop.f32.mrf.mxu0  ;;  %v994_v22 = vpop.f32.mrf.mxu1 }
 0x4e4   :  { %v1000_v23 = vrot.slane %v923_v7, 4  ;;  %v1019_v37 = vrot.slane %v994_v22, 4 }
 0x4e5   :  { %v925_v24 = vpop.f32.mrf.mxu0  ;;  %v1936_v25 = vpop.f32.mrf.mxu1 }
 0x4e6   :  { %v1004_v26 = vadd.f32 %v1000_v23, %v2509_v2  ;;  %v1001_v28 = vrot.slane %v925_v24, 4  ;;  %v1026_v23 = vrot.slane %v2765_v0, 7  ;;  %v2954_v0 = vld [vmem:[#allocation3 + $0xe8] sm:$0xff] }
 0x4e8   :  { %v1616_v27 = vmul.f32 -1.442695, %v1004_v26  ;;  %v1005_v10 = vadd.f32 %v1001_v28, %v3170_v58 }
 0x4ea   :  { %2090 = vpow2.f32 %v1616_v27  ;;  %v1617_v29 = vmul.f32 -1.442695, %v1005_v10  ;;  %v1033_v27 = vsub.s32 4, %v3172_v60 }
 0x4ec   :  { %2092 = vpow2.f32 %v1617_v29 }
 0x4f7   :  { %v2091_v30 = vpop.eup %2090 }
 0x4f8   :  { %v1012_v31 = vadd.f32 1.0, %v2091_v30  ;;  %v2966_v30 = vld [vmem:[#allocation3 + $0xb8] sm:$0xff] }
 0x4f9   :  { %v2093_v33 = vpop.eup %2092 }
 0x4fa   :  { %2094 = vrcp.f32 %v1012_v31  ;;  %v1013_v34 = vadd.f32 1.0, %v2093_v33  ;;  %v2972_v31 = vld [vmem:[#allocation3 + $0xa0] sm:$0xff]  ;;  %v2978_v33 = vld [vmem:[#allocation3 + $0x88] sm:$0xff] }
 0x4fc   :  { %2096 = vrcp.f32 %v1013_v34  ;;  %v2984_v34 = vld [vmem:[#allocation3 + $0x70] sm:$0xff] }
 0x507   :  { %v2095_v38 = vpop.eup %2094 }
 0x508   :  { %v1021_v40 = vmul.f32 %v2095_v38, %v1019_v37  ;;  %v2990_v37 = vld [vmem:[#allocation3 + $0x58] sm:$0xff]  ;;  %v2996_v38 = vld [vmem:[#allocation3 + $0x40] sm:$0xff] }
 0x509   :  { %v2097_v59 = vpop.eup %2096  ;;  %3193 = vst [vmem:[#allocation18_spill] sm:$0xff] %v2996_v38 }
 0x50a   :  { %v1022_v1 = vadd.f32 %v1021_v40, %v2521_v61  ;;  %v1024_v7 = vsub.f32 1.0, %v2097_v59  ;;  %v1028_v26 = vmul.f32 %v2097_v59, %v1026_v23  ;;  %v3002_v40 = vld [vmem:[#allocation3 + $0x28] sm:$0xff] }
 0x50b   :  { %3194 = vst [vmem:[#allocation11_spill] sm:$0xff] %v3002_v40 }
 0x50c   :  { %2098 = vtanh.f32 %v1022_v1  ;;  %v3009_v1 = vld [vmem:[#allocation3 + $0x10] sm:$0xff] }
 0x50d   :  { %3195 = vst [vmem:[#allocation7_spill] sm:$0xff] %v3009_v1 }
 0x519   :  { %v2099_v24 = vpop.eup %2098 }
 0x51a   :  { %v1025_v25 = vmul.f32 %v2099_v24, %v1024_v7 }
 0x51c   :  { %v2921_v28 = vadd.f32 %v1028_v26, %v1025_v25 }
 0x51e   :  { %v1037_v22 = vrot.slane %v2921_v28, 4  ;;  %v1034_v10 = vrot.slane %v2921_v28, %v1033_v27 }
 0x520   :  { %1104 = vmatmul.mubr.f32.vlgmr.msra.gmra.mxu0 %v1037_v22  ;;  %1970 = vmatmul.mubr.f32.vlgmr.msra.gmra.mxu1 %v1037_v22  ;;  %v2927_v29 = vsel %vm1030_vm6, %v1034_v10, %v2771_v57  ;;  %v2960_v57 = vld [vmem:[#allocation3 + $0xd0] sm:$0xff] }
 0x521   :  { %1222 = vmatpush1.msra.mxu0 %v2773_v3  ;;  %1973 = vmatpush3.msra.mxu1 %v2776_v54 }
 0x522   :  { %1223 = vmatprep.subr.mxu0 %v2779_v55  ;;  %1974 = vmatprep.subr.mxu1 %v3163_v56 }
 0x523   :  { %1224 = vmatpush1.msra.mxu0 %v2783_v45  ;;  %1975 = vmatpush3.msra.mxu1 %v2786_v44 }
 0x524   :  { %1225 = vmatprep.subr.mxu0 %v2789_v63  ;;  %1976 = vmatprep.subr.mxu1 %v3163_v56 }
 0x525   :  { %1226 = vmatpush1.msra.mxu0 %v2793_v62  ;;  %1977 = vmatpush3.msra.mxu1 %v2796_v47 }
 0x526   :  { %1227 = vmatprep.subr.mxu0 %v2799_v42  ;;  %1978 = vmatprep.subr.mxu1 %v3163_v56 }
 0x527   :  { %1228 = vmatpush1.msra.mxu0 %v2803_v53  ;;  %1979 = vmatpush3.msra.mxu1 %v2806_v51 }
 0x528   :  { %1229 = vmatprep.subr.mxu0 %v2809_v35  ;;  %1980 = vmatprep.subr.mxu1 %v3163_v56 }
 0x529   :  { %1230 = vmatpush1.msra.mxu0 %v2813_v49  ;;  %1981 = vmatpush3.msra.mxu1 %v2816_v41 }
 0x52a   :  { %1231 = vmatprep.subr.mxu0 %v2819_v52  ;;  %1982 = vmatprep.subr.mxu1 %v3163_v56 }
 0x52b   :  { %1232 = vmatpush1.msra.mxu0 %v2823_v5  ;;  %1983 = vmatpush3.msra.mxu1 %v2826_v6 }
 0x52c   :  { %1233 = vmatprep.subr.mxu0 %v2829_v8  ;;  %1984 = vmatprep.subr.mxu1 %v3163_v56 }
 0x52d   :  { %1234 = vmatpush1.msra.mxu0 %v2833_v9  ;;  %1985 = vmatpush3.msra.mxu1 %v2954_v0 }
 0x52e   :  { %1235 = vmatprep.subr.mxu0 %v2837_v11  ;;  %1986 = vmatprep.subr.mxu1 %v3163_v56 }
 0x52f   :  { %1236 = vmatpush1.msra.mxu0 %v2841_v12  ;;  %1987 = vmatpush3.msra.mxu1 %v2960_v57 }
 0x530   :  { %1237 = vmatprep.subr.mxu0 %v2845_v13  ;;  %1988 = vmatprep.subr.mxu1 %v3163_v56 }
 0x531   :  { %1238 = vmatpush1.msra.mxu0 %v2849_v14  ;;  %1989 = vmatpush3.msra.mxu1 %v2966_v30 }
 0x532   :  { %1239 = vmatprep.subr.mxu0 %v2853_v32  ;;  %1990 = vmatprep.subr.mxu1 %v3163_v56 }
 0x533   :  { %1240 = vmatpush1.msra.mxu0 %v2857_v15  ;;  %1991 = vmatpush3.msra.mxu1 %v2972_v31 }
 0x534   :  { %1241 = vmatprep.subr.mxu0 %v2861_v36  ;;  %1992 = vmatprep.subr.mxu1 %v3163_v56 }
 0x535   :  { %1242 = vmatpush1.msra.mxu0 %v2865_v16  ;;  %1993 = vmatpush3.msra.mxu1 %v2978_v33 }
 0x536   :  { %1243 = vmatprep.subr.mxu0 %v2869_v39  ;;  %1994 = vmatprep.subr.mxu1 %v3163_v56 }
 0x537   :  { %1244 = vmatpush1.msra.mxu0 %v2873_v17  ;;  %1995 = vmatpush3.msra.mxu1 %v2984_v34 }
 0x538   :  { %1245 = vmatprep.subr.mxu0 %v2877_v43  ;;  %1996 = vmatprep.subr.mxu1 %v3163_v56 }
 0x539   :  { %1246 = vmatpush1.msra.mxu0 %v2881_v18  ;;  %1997 = vmatpush3.msra.mxu1 %v2990_v37 }
 0x53a   :  { %1247 = vmatprep.subr.mxu0 %v2885_v46  ;;  %1998 = vmatprep.subr.mxu1 %v3163_v56 }
 0x53b   :  { %1248 = vmatpush1.msra.mxu0 %v2889_v19  ;;  %1999 = vmatpush3.msra.mxu1 %v2996_v38 }
 0x53c   :  { %1249 = vmatprep.subr.mxu0 %v2893_v48  ;;  %2000 = vmatprep.subr.mxu1 %v3163_v56 }
 0x53d   :  { %1250 = vmatpush1.msra.mxu0 %v2897_v20  ;;  %2001 = vmatpush3.msra.mxu1 %v3002_v40 }
 0x53e   :  { %1251 = vmatprep.subr.mxu0 %v2901_v50  ;;  %2002 = vmatprep.subr.mxu1 %v3163_v56 }
 0x53f   :  { %1252 = vmatpush1.msra.mxu0 %v2905_v21  ;;  %1285 = vmatprep.mubr.f32.mxu0 %v3163_v56 }
 0x540   :  { %2003 = vmatpush3.msra.mxu1 %v3009_v1  ;;  %2004 = vmatprep.mubr.msk.f32.mxu1 %vm2204_vm0, %v3163_v56 }
 0x541   :  { %1403 = vmatprep.subr.mxu0 %v2912_v4  ;;  %2007 = vmatprep.subr.mxu1 %v3163_v56 }
 0x5e0   :  { %v1105_v59 = vpop.f32.mrf.mxu0  ;;  %v1176_v7 = vpop.f32.mrf.mxu1 }
 0x5e1   :  { %v1182_v23 = vrot.slane %v1105_v59, 3  ;;  %v1201_v20 = vrot.slane %v1176_v7, 3 }
 0x5e2   :  { %v1107_v24 = vpop.f32.mrf.mxu0  ;;  %v1971_v25 = vpop.f32.mrf.mxu1 }
 0x5e3   :  { %v1186_v26 = vadd.f32 %v1182_v23, %v2509_v2  ;;  %v1183_v22 = vrot.slane %v1107_v24, 3  ;;  %v1208_v24 = vrot.slane %v2921_v28, 7 }
 0x5e5   :  { %v1618_v27 = vmul.f32 -1.442695, %v1186_v26  ;;  %v1187_v10 = vadd.f32 %v1183_v22, %v3170_v58 }
 0x5e7   :  { %2100 = vpow2.f32 %v1618_v27  ;;  %v1619_v1 = vmul.f32 -1.442695, %v1187_v10 }
 0x5e9   :  { %2102 = vpow2.f32 %v1619_v1  ;;  %v1215_v1 = vsub.s32 5, %v3172_v60 }
 0x5f4   :  { %v2101_v21 = vpop.eup %2100 }
 0x5f5   :  { %v1194_v50 = vadd.f32 1.0, %v2101_v21 }
 0x5f6   :  { %v2103_v4 = vpop.eup %2102 }
 0x5f7   :  { %2104 = vrcp.f32 %v1194_v50  ;;  %v1195_v40 = vadd.f32 1.0, %v2103_v4 }
 0x5f9   :  { %2106 = vrcp.f32 %v1195_v40 }
 0x604   :  { %v2105_v48 = vpop.eup %2104 }
 0x605   :  { %v1203_v38 = vmul.f32 %v2105_v48, %v1201_v20 }
 0x606   :  { %v2107_v23 = vpop.eup %2106 }
 0x607   :  { %v1204_v59 = vadd.f32 %v1203_v38, %v2521_v61  ;;  %v1206_v25 = vsub.f32 1.0, %v2107_v23  ;;  %v1210_v22 = vmul.f32 %v2107_v23, %v1208_v24 }
 0x609   :  { %2108 = vtanh.f32 %v1204_v59 }
 0x616   :  { %v2109_v26 = vpop.eup %2108 }
 0x617   :  { %v1207_v27 = vmul.f32 %v2109_v26, %v1206_v25 }
 0x619   :  { %v3021_v21 = vadd.f32 %v1210_v22, %v1207_v27 }
 0x61b   :  { %v1219_v50 = vrot.slane %v3021_v21, 5  ;;  %v1216_v48 = vrot.slane %v3021_v21, %v1215_v1 }
 0x61d   :  { %1286 = vmatmul.mubr.f32.vlgmr.msra.gmra.mxu0 %v1219_v50  ;;  %2005 = vmatmul.mubr.f32.vlgmr.msra.gmra.mxu1 %v1219_v50  ;;  %v3027_v20 = vsel %vm1212_vm7, %v1216_v48, %v2927_v29  ;;  %v1579_v48 = vsub.s32 7, %v3172_v60 }
 0x61e   :  { %1404 = vmatpush1.msra.mxu0 %v2773_v3  ;;  %2008 = vmatpush3.msra.mxu1 %v2776_v54  ;;  %v3196_v3 = vld [vmem:[#allocation18_spill] sm:$0xff]  ;;  %v3197_v54 = vld [vmem:[#allocation17_spill] sm:$0xff] }
 0x61f   :  { %1405 = vmatprep.subr.mxu0 %v2779_v55  ;;  %2009 = vmatprep.subr.mxu1 %v3163_v56  ;;  %v3198_v55 = vld [vmem:[#allocation15_spill] sm:$0xff] }
 0x620   :  { %1406 = vmatpush1.msra.mxu0 %v2783_v45  ;;  %2010 = vmatpush3.msra.mxu1 %v2786_v44  ;;  %v3199_v45 = vld [vmem:[#allocation11_spill] sm:$0xff]  ;;  %v3200_v44 = vld [vmem:[#allocation14_spill] sm:$0xff] }
 0x621   :  { %1407 = vmatprep.subr.mxu0 %v2789_v63  ;;  %2011 = vmatprep.subr.mxu1 %v3163_v56  ;;  %v3201_v63 = vld [vmem:[#allocation16_spill] sm:$0xff] }
 0x622   :  { %1408 = vmatpush1.msra.mxu0 %v2793_v62  ;;  %2012 = vmatpush3.msra.mxu1 %v2796_v47  ;;  %v3202_v62 = vld [vmem:[#allocation7_spill] sm:$0xff] }
 0x623   :  { %1409 = vmatprep.subr.mxu0 %v2799_v42  ;;  %2013 = vmatprep.subr.mxu1 %v3163_v56 }
 0x624   :  { %1410 = vmatpush1.msra.mxu0 %v2803_v53  ;;  %2014 = vmatpush3.msra.mxu1 %v2806_v51 }
 0x625   :  { %1411 = vmatprep.subr.mxu0 %v2809_v35  ;;  %2015 = vmatprep.subr.mxu1 %v3163_v56 }
 0x626   :  { %1412 = vmatpush1.msra.mxu0 %v2813_v49  ;;  %2016 = vmatpush3.msra.mxu1 %v2816_v41 }
 0x627   :  { %1413 = vmatprep.subr.mxu0 %v2819_v52  ;;  %2017 = vmatprep.subr.mxu1 %v3163_v56 }
 0x628   :  { %1414 = vmatpush1.msra.mxu0 %v2823_v5  ;;  %2018 = vmatpush3.msra.mxu1 %v2826_v6 }
 0x629   :  { %1415 = vmatprep.subr.mxu0 %v2829_v8  ;;  %2019 = vmatprep.subr.mxu1 %v3163_v56 }
 0x62a   :  { %1416 = vmatpush1.msra.mxu0 %v2833_v9  ;;  %2020 = vmatpush3.msra.mxu1 %v2954_v0 }
 0x62b   :  { %1417 = vmatprep.subr.mxu0 %v2837_v11  ;;  %2021 = vmatprep.subr.mxu1 %v3163_v56 }
 0x62c   :  { %1418 = vmatpush1.msra.mxu0 %v2841_v12  ;;  %2022 = vmatpush3.msra.mxu1 %v2960_v57 }
 0x62d   :  { %1419 = vmatprep.subr.mxu0 %v2845_v13  ;;  %2023 = vmatprep.subr.mxu1 %v3163_v56 }
 0x62e   :  { %1420 = vmatpush1.msra.mxu0 %v2849_v14  ;;  %2024 = vmatpush3.msra.mxu1 %v2966_v30 }
 0x62f   :  { %1421 = vmatprep.subr.mxu0 %v2853_v32  ;;  %2025 = vmatprep.subr.mxu1 %v3163_v56 }
 0x630   :  { %1422 = vmatpush1.msra.mxu0 %v2857_v15  ;;  %2026 = vmatpush3.msra.mxu1 %v2972_v31 }
 0x631   :  { %1423 = vmatprep.subr.mxu0 %v2861_v36  ;;  %2027 = vmatprep.subr.mxu1 %v3163_v56 }
 0x632   :  { %1424 = vmatpush1.msra.mxu0 %v2865_v16  ;;  %2028 = vmatpush3.msra.mxu1 %v2978_v33  ;;  %v1390_v16 = vrot.slane %v3021_v21, 7 }
 0x633   :  { %1425 = vmatprep.subr.mxu0 %v2869_v39  ;;  %2029 = vmatprep.subr.mxu1 %v3163_v56 }
 0x634   :  { %1426 = vmatpush1.msra.mxu0 %v2873_v17  ;;  %2030 = vmatpush3.msra.mxu1 %v2984_v34 }
 0x635   :  { %1427 = vmatprep.subr.mxu0 %v2877_v43  ;;  %2031 = vmatprep.subr.mxu1 %v3163_v56 }
 0x636   :  { %1428 = vmatpush1.msra.mxu0 %v2881_v18  ;;  %2032 = vmatpush3.msra.mxu1 %v2990_v37  ;;  %v1397_v18 = vsub.s32 6, %v3172_v60 }
 0x637   :  { %1429 = vmatprep.subr.mxu0 %v2885_v46  ;;  %2033 = vmatprep.subr.mxu1 %v3163_v56 }
 0x638   :  { %1430 = vmatpush1.msra.mxu0 %v2889_v19  ;;  %2034 = vmatpush3.msra.mxu1 %v3196_v3  ;;  %v1624_v3 = vld [vmem:[%s3116_s4] ss:$0 sm:$0xff] }
 0x639   :  { %1431 = vmatprep.subr.mxu0 %v3197_v54  ;;  %2035 = vmatprep.subr.mxu1 %v3163_v56 }
 0x63a   :  { %1432 = vmatpush1.msra.mxu0 %v3198_v55  ;;  %2036 = vmatpush3.msra.mxu1 %v3199_v45 }
 0x63b   :  { %1433 = vmatprep.subr.mxu0 %v3200_v44  ;;  %2037 = vmatprep.subr.mxu1 %v3163_v56 }
 0x63c   :  { %1434 = vmatpush1.msra.mxu0 %v3201_v63  ;;  %1467 = vmatprep.mubr.f32.mxu0 %v3163_v56 }
 0x63d   :  { %2038 = vmatpush3.msra.mxu1 %v3202_v62  ;;  %2039 = vmatprep.mubr.msk.f32.mxu1 %vm2204_vm0, %v3163_v56 }
 0x6dd   :  { %v1287_v47 = vpop.f32.mrf.mxu0  ;;  %v1358_v42 = vpop.f32.mrf.mxu1 }
 0x6de   :  { %v1364_v53 = vrot.slane %v1287_v47, 2  ;;  %v1383_v56 = vrot.slane %v1358_v42, 2 }
 0x6df   :  { %v1289_v51 = vpop.f32.mrf.mxu0  ;;  %v2006_v35 = vpop.f32.mrf.mxu1 }
 0x6e0   :  { %v1368_v49 = vadd.f32 %v1364_v53, %v2509_v2  ;;  %v1365_v52 = vrot.slane %v1289_v51, 2 }
 0x6e2   :  { %v1620_v41 = vmul.f32 -1.442695, %v1368_v49  ;;  %v1369_v5 = vadd.f32 %v1365_v52, %v3170_v58 }
 0x6e4   :  { %2110 = vpow2.f32 %v1620_v41  ;;  %v1621_v6 = vmul.f32 -1.442695, %v1369_v5 }
 0x6e6   :  { %2112 = vpow2.f32 %v1621_v6 }
 0x6f1   :  { %v2111_v8 = vpop.eup %2110 }
 0x6f2   :  { %v1376_v9 = vadd.f32 1.0, %v2111_v8 }
 0x6f3   :  { %v2113_v11 = vpop.eup %2112 }
 0x6f4   :  { %2114 = vrcp.f32 %v1376_v9  ;;  %v1377_v12 = vadd.f32 1.0, %v2113_v11 }
 0x6f6   :  { %2116 = vrcp.f32 %v1377_v12 }
 0x701   :  { %v2115_v13 = vpop.eup %2114 }
 0x702   :  { %v1385_v14 = vmul.f32 %v2115_v13, %v1383_v56 }
 0x703   :  { %v2117_v15 = vpop.eup %2116 }
 0x704   :  { %v1386_v32 = vadd.f32 %v1385_v14, %v2521_v61  ;;  %v1388_v36 = vsub.f32 1.0, %v2117_v15  ;;  %v1392_v43 = vmul.f32 %v2117_v15, %v1390_v16 }
 0x706   :  { %2118 = vtanh.f32 %v1386_v32 }
 0x713   :  { %v2119_v39 = vpop.eup %2118 }
 0x714   :  { %v1389_v17 = vmul.f32 %v2119_v39, %v1388_v36 }
 0x716   :  { %v1393_v46 = vadd.f32 %v1392_v43, %v1389_v17 }
 0x718   :  { %v1401_v19 = vrot.slane %v1393_v46, 6  ;;  %v1398_v28 = vrot.slane %v1393_v46, %v1397_v18  ;;  %v1572_v1 = vrot.slane %v1393_v46, 7 }
 0x71a   :  { %1468 = vmatmul.mubr.f32.vlgmr.msra.gmra.mxu0 %v1401_v19  ;;  %2040 = vmatmul.mubr.f32.vlgmr.msra.gmra.mxu1 %v1401_v19  ;;  %v1399_v29 = vsel %vm1394_vm8, %v1398_v28, %v3027_v20 }
 0x7da   :  { %v1469_v0 = vpop.f32.mrf.mxu0  ;;  %v1540_v57 = vpop.f32.mrf.mxu1 }
 0x7db   :  { %v1546_v30 = vrot.slane %v1469_v0, 1  ;;  %v1565_v25 = vrot.slane %v1540_v57, 1 }
 0x7dc   :  { %v1471_v31 = vpop.f32.mrf.mxu0  ;;  %v2041_v33 = vpop.f32.mrf.mxu1 }
 0x7dd   :  { %v1550_v34 = vadd.f32 %v1546_v30, %v2509_v2  ;;  %v1547_v38 = vrot.slane %v1471_v31, 1 }
 0x7df   :  { %v1622_v37 = vmul.f32 -1.442695, %v1550_v34  ;;  %v1551_v40 = vadd.f32 %v1547_v38, %v3170_v58 }
 0x7e1   :  { %2120 = vpow2.f32 %v1622_v37  ;;  %v1623_v7 = vmul.f32 -1.442695, %v1551_v40 }
 0x7e3   :  { %2122 = vpow2.f32 %v1623_v7 }
 0x7ee   :  { %v2121_v10 = vpop.eup %2120 }
 0x7ef   :  { %v1558_v4 = vadd.f32 1.0, %v2121_v10 }
 0x7f0   :  { %v2123_v59 = vpop.eup %2122 }
 0x7f1   :  { %2124 = vrcp.f32 %v1558_v4  ;;  %v1559_v23 = vadd.f32 1.0, %v2123_v59 }
 0x7f3   :  { %2126 = vrcp.f32 %v1559_v23 }
 0x7fe   :  { %v2125_v24 = vpop.eup %2124 }
 0x7ff   :  { %v1567_v26 = vmul.f32 %v2125_v24, %v1565_v25 }
 0x800   :  { %v2127_v2 = vpop.eup %2126 }
 0x801   :  { %v1568_v27 = vadd.f32 %v1567_v26, %v2521_v61  ;;  %v1570_v22 = vsub.f32 1.0, %v2127_v2  ;;  %v1574_v58 = vmul.f32 %v2127_v2, %v1572_v1  ;;  %v1625_v61 = vld [vmem:[#allocation2] ss:$0 sm:$0xff] }
 0x803   :  { %2128 = vtanh.f32 %v1568_v27 }
 0x810   :  { %v2129_v21 = vpop.eup %2128 }
 0x811   :  { %v1571_v50 = vmul.f32 %v2129_v21, %v1570_v22 }
 0x813   :  { %v1575_v20 = vadd.f32 %v1574_v58, %v1571_v50 }
 0x815   :  { %v1580_v54 = vrot.slane %v1575_v20, %v1579_v48 }
 0x817   :  { %v1581_v55 = vsel %vm1576_vm9, %v1580_v54, %v1399_v29 }
 0x818   :  { %v1588_v45 = vmul.f32 %v1624_v3, %v1581_v55 }
 0x81a   :  { %1589 = vadd.xlane.f32.xlu0 %v1588_v45 }
 0x8a3   :  { %v1590_v44 = vpop.xlane.xlu0 %1589 }
 0x8a4   :  { %v1597_v63 = vadd.f32 %v1625_v61, %v1590_v44 }
 0x8a6   :  { %1599 = vst.msk [vmem:[%s3118_s6] sm:$0xff] %vm1598_vm10, %v1597_v63 }
 0x8a7   :  { %1604 = vsyncpa [#allocation4], 1 }

</bundles_post_ra>
